<compile_context>
chip_gen: v7x
topology: tpu7x:2x2x1
jax: 0.10.0
libtpu: 0.0.40
codegen_flags: <defaults>
</compile_context>

<pallas_src>
import functools

import jax
import jax.numpy as jnp
from jax import lax
from jax.experimental import pallas as pl
from jax.experimental.pallas import tpu as pltpu


# ------------------------------- fused kernel -------------------------------

def mfa_kernel(xft_ref, xfm_ref, xfb_ref,
               x1t_ref, x1m_ref, x1b_ref,
               x2t_ref, x2m_ref, x2b_ref,
               wa_ref, wb_ref, bias_ref, o_ref, *, S, W, C):
    """One (batch, row-strip) grid step.

    x?m_ref : (S, W, C)  strip of x_ful / x1 / x2 (NHWC, batch squeezed).
    x?t_ref / x?b_ref : (1, W, C) halo rows above / below the strip (row index clamped at
        the image border by the BlockSpec index_map; masked to zero here when invalid).
    wa_ref / wb_ref : (C, 9C) bf16 tap-stacked, BN-folded conv weights for the x_ful*x1 /
        x_ful*x2 halves of the (never materialized) channel concat.
    bias_ref : (1, C) f32 BN-folded bias.        o_ref : (S, W, C) output strip.
    """
    f32 = jnp.float32
    s = pl.program_id(1)
    top_keep = (s > 0).astype(f32)                        # top halo row inside the image?
    bot_keep = (s < pl.num_programs(1) - 1).astype(f32)   # bottom halo row inside?

    xf_main = xfm_ref[...].astype(f32)                                     # (S, W, C)
    # Row-halo assembly: concat along the leading (non-tiled) axis is layout-free.
    xf = jnp.concatenate([xft_ref[...].astype(f32) * top_keep,
                          xf_main,
                          xfb_ref[...].astype(f32) * bot_keep], axis=0)    # (S+2, W, C)
    x1 = jnp.concatenate([x1t_ref[...], x1m_ref[...], x1b_ref[...]], axis=0).astype(f32)
    x2 = jnp.concatenate([x2t_ref[...], x2m_ref[...], x2b_ref[...]], axis=0).astype(f32)

    a = xf * x1            # x_ful * x1   (halo rows already zeroed through xf)
    b = xf * x2            # x_ful * x2

    # Tap-stacked conv matmul: rows = pixels of the row-haloed strip, N = 9 taps x C.
    # (S+2, W, C) -> ((S+2)*W, C) is layout-preserving for W % 8 == 0.
    rows = (S + 2) * W
    m = (jnp.dot(a.reshape(rows, C).astype(jnp.bfloat16), wa_ref[...],
                 preferred_element_type=f32)
         + jnp.dot(b.reshape(rows, C).astype(jnp.bfloat16), wb_ref[...],
                   preferred_element_type=f32))                            # (rows, 9C) f32
    m3 = m.reshape(S + 2, W, 9 * C)

    # Column (padding=1) halo: shifted copies of m3 along W on the XLU, with the wrapped
    # column masked to zero.  pltpu.roll follows jnp.roll semantics: out[j] = in[j-shift].
    col = lax.broadcasted_iota(jnp.int32, (1, W, 1), 1)
    m3_l = jnp.where(col >= 1, pltpu.roll(m3, 1, axis=1), 0.0)        # input col j-1 -> out col j
    m3_r = jnp.where(col <= W - 2, pltpu.roll(m3, W - 1, axis=1), 0.0)  # input col j+1 -> out col j
    src = (m3_l, m3, m3_r)                                             # indexed by dw

    # out[i, j, :] = sum_{dh,dw} tap(dh,dw) applied at input pixel (i+dh-1, j+dw-1);
    # the haloed local row of that pixel is i+dh (handled by the row slice below).
    acc = jnp.zeros((S, W, C), f32)
    for dh in range(3):
        for dw in range(3):
            t = dh * 3 + dw
            acc = acc + src[dw][dh:dh + S, :, t * C:(t + 1) * C]

    y = acc + bias_ref[0].astype(f32)                                  # (C,) broadcasts
    o_ref[...] = jnp.maximum(xf_main + y, 0.0).astype(o_ref.dtype)


# ------------------------------- pallas wrapper ------------------------------

def _pick_strip(h):
    # Largest divisor of H <= 32 rows: keeps the double-buffered per-step working set
    # comfortably inside v7x's 64 MiB VMEM (48 MiB budget below) while giving the
    # software pipeline / megacore several steps per image.
    if h <= 8:
        return h
    cap = min(32, h // 2)
    for s in range(cap, 0, -1):
        if h % s == 0:
            return s
    return h


def _mfa_pallas(xf, x1, x2, w_a, w_b, bias):
    B, H, W, C = xf.shape
    strip = _pick_strip(H)
    ns = H // strip

    main = pl.BlockSpec((None, strip, W, C), lambda b, s: (b, s, 0, 0))
    top = pl.BlockSpec((None, 1, W, C),
                       lambda b, s: (b, jnp.maximum(s * strip - 1, 0), 0, 0))
    bot = pl.BlockSpec((None, 1, W, C),
                       lambda b, s: (b, jnp.minimum((s + 1) * strip, H - 1), 0, 0))
    const2 = lambda b, s: (0, 0)

    kern = functools.partial(mfa_kernel, S=strip, W=W, C=C)
    return pl.pallas_call(
        kern,
        out_shape=jax.ShapeDtypeStruct((B, H, W, C), xf.dtype),
        grid=(B, ns),
        in_specs=[
            top, main, bot,                       # x_ful (strip + clamped halo rows)
            top, main, bot,                       # x1
            top, main, bot,                       # x2
            pl.BlockSpec((C, 9 * C), const2),     # w_a: constant index_map -> stays resident
            pl.BlockSpec((C, 9 * C), const2),     # w_b
            pl.BlockSpec((1, C), const2),         # BN-folded bias
        ],
        out_specs=main,
        compiler_params=pltpu.CompilerParams(
            dimension_semantics=("parallel", "parallel"),
            vmem_limit_bytes=48 * 1024 * 1024),
    )(xf, xf, xf, x1, x1, x1, x2, x2, x2, w_a, w_b, bias)


# ------------------------------- module wrapper ------------------------------

def init_params(key, in_dim):
    ks = jax.random.split(key, 6)
    return {
        # Conv2d(2*in_dim -> in_dim, 3x3, padding=1, bias=True), PyTorch OIHW layout
        "conv_w": 0.1 * jax.random.normal(ks[0], (in_dim, 2 * in_dim, 3, 3), jnp.float32),
        "conv_b": 0.1 * jax.random.normal(ks[1], (in_dim,), jnp.float32),
        # BatchNorm2d(in_dim): affine params + running stats (inference semantics)
        "bn_w": 1.0 + 0.1 * jax.random.normal(ks[2], (in_dim,), jnp.float32),
        "bn_b": 0.1 * jax.random.normal(ks[3], (in_dim,), jnp.float32),
        "bn_rm": 0.1 * jax.random.normal(ks[4], (in_dim,), jnp.float32),
        "bn_rv": 1.0 + 0.1 * jnp.abs(jax.random.normal(ks[5], (in_dim,), jnp.float32)),
    }


def _fold_bn_into_conv(params, C):
    """Fold eval-mode BatchNorm into the conv; return ((C,9C),(C,9C)) bf16 + (1,C) f32."""
    eps = 1e-5
    scale = params["bn_w"] * lax.rsqrt(params["bn_rv"] + eps)               # (C,)
    w = params["conv_w"] * scale[:, None, None, None]                       # OIHW * out-scale
    w_hwio = jnp.transpose(w, (2, 3, 1, 0))                                 # (3, 3, 2C, C)

    def stack(half):   # (3,3,C,C) -> (C, 9C), columns ordered [tap, out_channel]
        return jnp.transpose(half.reshape(9, C, C), (1, 0, 2)).reshape(C, 9 * C)

    w_a = stack(w_hwio[:, :, :C, :]).astype(jnp.bfloat16)   # x_ful*x1 half of the concat
    w_b = stack(w_hwio[:, :, C:, :]).astype(jnp.bfloat16)   # x_ful*x2 half
    bias = ((params["conv_b"] - params["bn_rm"]) * scale + params["bn_b"]).reshape(1, C)
    return w_a, w_b, bias


def mfa_forward(x_ful, x1, x2, params):
    """x_ful, x1, x2: (B, C, H, W) NCHW, like the PyTorch module (eval-mode BatchNorm)."""
    B, C, H, W = x_ful.shape
    assert W % 8 == 0, "kernel assumes image width is a multiple of 8 (TPU sublane tile)"
    w_a, w_b, bias = _fold_bn_into_conv(params, C)
    to_nhwc = lambda t: jnp.transpose(t, (0, 2, 3, 1))   # channels-last: C on the lane axis
    out = _mfa_pallas(to_nhwc(x_ful), to_nhwc(x1), to_nhwc(x2), w_a, w_b, bias)
    return jnp.transpose(out, (0, 3, 1, 2))              # back to NCHW


# ----------------------------- pure-JAX references ---------------------------

def mfa_reference(x_ful, x1, x2, p):
    """Exact f32 PyTorch-semantics reference (eval-mode BatchNorm)."""
    a = x_ful * x1
    b = x_ful * x2
    cat = jnp.concatenate([a, b], axis=1)
    y = lax.conv_general_dilated(
        cat, p["conv_w"], window_strides=(1, 1), padding=((1, 1), (1, 1)),
        dimension_numbers=("NCHW", "OIHW", "NCHW"),
        precision=lax.Precision.HIGHEST)
    y = y + p["conv_b"][None, :, None, None]
    s = p["bn_w"] * lax.rsqrt(p["bn_rv"] + 1e-5)
    y = (y - p["bn_rm"][None, :, None, None]) * s[None, :, None, None] \
        + p["bn_b"][None, :, None, None]
    return jnp.maximum(x_ful + y, 0.0)


def mfa_reference_bf16(x_ful, x1, x2, p):
    """Reference with the same BN fold and bf16 MXU-operand rounding as the kernel."""
    s = p["bn_w"] * lax.rsqrt(p["bn_rv"] + 1e-5)
    w = (p["conv_w"] * s[:, None, None, None]).astype(jnp.bfloat16)
    bias = (p["conv_b"] - p["bn_rm"]) * s + p["bn_b"]
    cat = jnp.concatenate([x_ful * x1, x_ful * x2], axis=1).astype(jnp.bfloat16)
    y = lax.conv_general_dilated(
        cat, w, window_strides=(1, 1), padding=((1, 1), (1, 1)),
        dimension_numbers=("NCHW", "OIHW", "NCHW"),
        preferred_element_type=jnp.float32)
    y = y + bias[None, :, None, None]
    return jnp.maximum(x_ful + y, 0.0)


if __name__ == "__main__":
    in_dim, B, H, W = 4, 2, 16, 16

    key = jax.random.PRNGKey(0)
    k1, k2, k3, kp = jax.random.split(key, 4)
    x_ful = jax.random.normal(k1, (B, in_dim, H, W), jnp.float32)
    x1 = jax.random.normal(k2, (B, in_dim, H, W), jnp.float32)
    x2 = jax.random.normal(k3, (B, in_dim, H, W), jnp.float32)
    params = init_params(kp, in_dim)

    out = jax.block_until_ready(jax.jit(mfa_forward)(x_ful, x1, x2, params))

    assert out.shape == (B, in_dim, H, W)
    assert bool(jnp.all(jnp.isfinite(out)))

    # Tight check: reference with identical bf16 MXU-operand rounding -> validates the
    # fused conv / halo / BN-fold / residual logic to f32-accumulation accuracy.
    ref_bf16 = jax.block_until_ready(mfa_reference_bf16(x_ful, x1, x2, params))
    err_tight = float(jnp.max(jnp.abs(out - ref_bf16)))
    assert err_tight < 2e-3, f"mismatch vs bf16-matched reference: max abs err = {err_tight}"

    # Sanity check vs the exact f32 PyTorch-semantics reference; the remaining gap is
    # purely bf16 MXU operand rounding (the tight check above is the correctness gate).
    ref = jax.block_until_ready(mfa_reference(x_ful, x1, x2, params))
    err = float(jnp.max(jnp.abs(out - ref)))
    assert err < 1e-1, f"mismatch vs f32 reference: max abs err = {err}"

    print("KERNEL_OK")
</pallas_src>

<mosaic_0001>
module attributes {stable_mosaic.version = 11 : i64} {
  func.func @mfa_kernel(%arg0: i32, %arg1: i32, %arg2: memref<1x1x16x4xf32, #tpu.memory_space<vmem>>, %arg3: memref<1x8x16x4xf32, #tpu.memory_space<vmem>>, %arg4: memref<1x1x16x4xf32, #tpu.memory_space<vmem>>, %arg5: memref<1x1x16x4xf32, #tpu.memory_space<vmem>>, %arg6: memref<1x8x16x4xf32, #tpu.memory_space<vmem>>, %arg7: memref<1x1x16x4xf32, #tpu.memory_space<vmem>>, %arg8: memref<1x1x16x4xf32, #tpu.memory_space<vmem>>, %arg9: memref<1x8x16x4xf32, #tpu.memory_space<vmem>>, %arg10: memref<1x1x16x4xf32, #tpu.memory_space<vmem>>, %arg11: memref<4x36xbf16, #tpu.memory_space<vmem>>, %arg12: memref<4x36xbf16, #tpu.memory_space<vmem>>, %arg13: memref<1x4xf32, #tpu.memory_space<vmem>>, %arg14: memref<1x8x16x4xf32, #tpu.memory_space<vmem>>) attributes {dimension_semantics = [#tpu.dimension_semantics<parallel>, #tpu.dimension_semantics<parallel>], iteration_bounds = array<i64: 2, 2>, scalar_prefetch = 0 : i64, scratch_operands = 0 : i64, tpu.core_type = #tpu.core_type<tc>, window_params = [{transform_indices = @transform_0, window_bounds = array<i64: 1, 1, 16, 4>}, {transform_indices = @transform_1, window_bounds = array<i64: 1, 8, 16, 4>}, {transform_indices = @transform_2, window_bounds = array<i64: 1, 1, 16, 4>}, {transform_indices = @transform_3, window_bounds = array<i64: 1, 1, 16, 4>}, {transform_indices = @transform_4, window_bounds = array<i64: 1, 8, 16, 4>}, {transform_indices = @transform_5, window_bounds = array<i64: 1, 1, 16, 4>}, {transform_indices = @transform_6, window_bounds = array<i64: 1, 1, 16, 4>}, {transform_indices = @transform_7, window_bounds = array<i64: 1, 8, 16, 4>}, {transform_indices = @transform_8, window_bounds = array<i64: 1, 1, 16, 4>}, {pipeline_mode = #tpu.pipeline_mode<synchronous>, transform_indices = @transform_9, window_bounds = array<i64: 4, 36>}, {pipeline_mode = #tpu.pipeline_mode<synchronous>, transform_indices = @transform_10, window_bounds = array<i64: 4, 36>}, {pipeline_mode = #tpu.pipeline_mode<synchronous>, transform_indices = @transform_11, window_bounds = array<i64: 1, 4>}, {transform_indices = @transform_12, window_bounds = array<i64: 1, 8, 16, 4>}]} {
    %c0_i32 = arith.constant 0 : i32
    %0 = arith.cmpi sgt, %arg1, %c0_i32 : i32
    %1 = arith.extui %0 : i1 to i32
    %2 = arith.sitofp %1 : i32 to f32
    %c1_i32 = arith.constant 1 : i32
    %3 = arith.cmpi slt, %arg1, %c1_i32 : i32
    %4 = arith.extui %3 : i1 to i32
    %5 = arith.sitofp %4 : i32 to f32
    %c0 = arith.constant 0 : index
    %c0_0 = arith.constant 0 : index
    %c0_1 = arith.constant 0 : index
    %c0_2 = arith.constant 0 : index
    %6 = vector.load %arg3[%c0, %c0_0, %c0_1, %c0_2] : memref<1x8x16x4xf32, #tpu.memory_space<vmem>>, vector<1x8x16x4xf32>
    %7 = vector.shape_cast %6 : vector<1x8x16x4xf32> to vector<8x16x4xf32>
    %c0_3 = arith.constant 0 : index
    %c0_4 = arith.constant 0 : index
    %c0_5 = arith.constant 0 : index
    %c0_6 = arith.constant 0 : index
    %8 = vector.load %arg2[%c0_3, %c0_4, %c0_5, %c0_6] : memref<1x1x16x4xf32, #tpu.memory_space<vmem>>, vector<1x1x16x4xf32>
    %9 = vector.shape_cast %8 : vector<1x1x16x4xf32> to vector<1x16x4xf32>
    %10 = vector.broadcast %2 : f32 to vector<1x16x4xf32>
    %11 = arith.mulf %9, %10 : vector<1x16x4xf32>
    %c0_7 = arith.constant 0 : index
    %c0_8 = arith.constant 0 : index
    %c0_9 = arith.constant 0 : index
    %c0_10 = arith.constant 0 : index
    %12 = vector.load %arg4[%c0_7, %c0_8, %c0_9, %c0_10] : memref<1x1x16x4xf32, #tpu.memory_space<vmem>>, vector<1x1x16x4xf32>
    %13 = vector.shape_cast %12 : vector<1x1x16x4xf32> to vector<1x16x4xf32>
    %14 = vector.broadcast %5 : f32 to vector<1x16x4xf32>
    %15 = arith.mulf %13, %14 : vector<1x16x4xf32>
    %16 = tpu.concatenate %11, %7, %15 in 0 : vector<1x16x4xf32>, vector<8x16x4xf32>, vector<1x16x4xf32> -> vector<10x16x4xf32>
    %c0_11 = arith.constant 0 : index
    %c0_12 = arith.constant 0 : index
    %c0_13 = arith.constant 0 : index
    %c0_14 = arith.constant 0 : index
    %17 = vector.load %arg5[%c0_11, %c0_12, %c0_13, %c0_14] : memref<1x1x16x4xf32, #tpu.memory_space<vmem>>, vector<1x1x16x4xf32>
    %18 = vector.shape_cast %17 : vector<1x1x16x4xf32> to vector<1x16x4xf32>
    %c0_15 = arith.constant 0 : index
    %c0_16 = arith.constant 0 : index
    %c0_17 = arith.constant 0 : index
    %c0_18 = arith.constant 0 : index
    %19 = vector.load %arg6[%c0_15, %c0_16, %c0_17, %c0_18] : memref<1x8x16x4xf32, #tpu.memory_space<vmem>>, vector<1x8x16x4xf32>
    %20 = vector.shape_cast %19 : vector<1x8x16x4xf32> to vector<8x16x4xf32>
    %c0_19 = arith.constant 0 : index
    %c0_20 = arith.constant 0 : index
    %c0_21 = arith.constant 0 : index
    %c0_22 = arith.constant 0 : index
    %21 = vector.load %arg7[%c0_19, %c0_20, %c0_21, %c0_22] : memref<1x1x16x4xf32, #tpu.memory_space<vmem>>, vector<1x1x16x4xf32>
    %22 = vector.shape_cast %21 : vector<1x1x16x4xf32> to vector<1x16x4xf32>
    %23 = tpu.concatenate %18, %20, %22 in 0 : vector<1x16x4xf32>, vector<8x16x4xf32>, vector<1x16x4xf32> -> vector<10x16x4xf32>
    %c0_23 = arith.constant 0 : index
    %c0_24 = arith.constant 0 : index
    %c0_25 = arith.constant 0 : index
    %c0_26 = arith.constant 0 : index
    %24 = vector.load %arg8[%c0_23, %c0_24, %c0_25, %c0_26] : memref<1x1x16x4xf32, #tpu.memory_space<vmem>>, vector<1x1x16x4xf32>
    %25 = vector.shape_cast %24 : vector<1x1x16x4xf32> to vector<1x16x4xf32>
    %c0_27 = arith.constant 0 : index
    %c0_28 = arith.constant 0 : index
    %c0_29 = arith.constant 0 : index
    %c0_30 = arith.constant 0 : index
    %26 = vector.load %arg9[%c0_27, %c0_28, %c0_29, %c0_30] : memref<1x8x16x4xf32, #tpu.memory_space<vmem>>, vector<1x8x16x4xf32>
    %27 = vector.shape_cast %26 : vector<1x8x16x4xf32> to vector<8x16x4xf32>
    %c0_31 = arith.constant 0 : index
    %c0_32 = arith.constant 0 : index
    %c0_33 = arith.constant 0 : index
    %c0_34 = arith.constant 0 : index
    %28 = vector.load %arg10[%c0_31, %c0_32, %c0_33, %c0_34] : memref<1x1x16x4xf32, #tpu.memory_space<vmem>>, vector<1x1x16x4xf32>
    %29 = vector.shape_cast %28 : vector<1x1x16x4xf32> to vector<1x16x4xf32>
    %30 = tpu.concatenate %25, %27, %29 in 0 : vector<1x16x4xf32>, vector<8x16x4xf32>, vector<1x16x4xf32> -> vector<10x16x4xf32>
    %31 = arith.mulf %16, %23 : vector<10x16x4xf32>
    %32 = arith.mulf %16, %30 : vector<10x16x4xf32>
    %33 = vector.shape_cast %31 : vector<10x16x4xf32> to vector<160x4xf32>
    %34 = arith.truncf %33 : vector<160x4xf32> to vector<160x4xbf16>
    %c0_35 = arith.constant 0 : index
    %c0_36 = arith.constant 0 : index
    %35 = vector.load %arg11[%c0_35, %c0_36] : memref<4x36xbf16, #tpu.memory_space<vmem>>, vector<4x36xbf16>
    %cst = arith.constant dense<0.000000e+00> : vector<160x36xf32>
    %36 = tpu.matmul %34, %35, %cst {dimension_numbers = #tpu.dot_dimension_numbers<[1], [0], [0], [1], [0, 0, 1, 1], [], []>} : vector<160x4xbf16>, vector<4x36xbf16>, vector<160x36xf32> -> vector<160x36xf32>
    %37 = vector.shape_cast %32 : vector<10x16x4xf32> to vector<160x4xf32>
    %38 = arith.truncf %37 : vector<160x4xf32> to vector<160x4xbf16>
    %c0_37 = arith.constant 0 : index
    %c0_38 = arith.constant 0 : index
    %39 = vector.load %arg12[%c0_37, %c0_38] : memref<4x36xbf16, #tpu.memory_space<vmem>>, vector<4x36xbf16>
    %cst_39 = arith.constant dense<0.000000e+00> : vector<160x36xf32>
    %40 = tpu.matmul %38, %39, %cst_39 {dimension_numbers = #tpu.dot_dimension_numbers<[1], [0], [0], [1], [0, 0, 1, 1], [], []>} : vector<160x4xbf16>, vector<4x36xbf16>, vector<160x36xf32> -> vector<160x36xf32>
    %41 = arith.addf %36, %40 : vector<160x36xf32>
    %42 = vector.shape_cast %41 : vector<160x36xf32> to vector<10x16x36xf32>
    %43 = tpu.iota {dimensions = array<i32: 1>} : vector<1x16x1xi32>
    %c1_i32_40 = arith.constant 1 : i32
    %44 = vector.broadcast %c1_i32_40 : i32 to vector<1x16x1xi32>
    %45 = arith.cmpi sge, %43, %44 : vector<1x16x1xi32>
    %c1_i32_41 = arith.constant 1 : i32
    %46 = tpu.dynamic_rotate %42 by %c1_i32_41 dim 1 : vector<10x16x36xf32>, i32 -> vector<10x16x36xf32>
    %cst_42 = arith.constant 0.000000e+00 : f32
    %47 = vector.shape_cast %45 : vector<1x16x1xi1> to vector<1x16x1xi1>
    %48 = vector.broadcast %47 : vector<1x16x1xi1> to vector<10x16x36xi1>
    %49 = vector.broadcast %cst_42 : f32 to vector<10x16x36xf32>
    %50 = arith.select %48, %46, %49 : vector<10x16x36xi1>, vector<10x16x36xf32>
    %c14_i32 = arith.constant 14 : i32
    %51 = vector.broadcast %c14_i32 : i32 to vector<1x16x1xi32>
    %52 = arith.cmpi sle, %43, %51 : vector<1x16x1xi32>
    %c15_i32 = arith.constant 15 : i32
    %53 = tpu.dynamic_rotate %42 by %c15_i32 dim 1 : vector<10x16x36xf32>, i32 -> vector<10x16x36xf32>
    %cst_43 = arith.constant 0.000000e+00 : f32
    %54 = vector.shape_cast %52 : vector<1x16x1xi1> to vector<1x16x1xi1>
    %55 = vector.broadcast %54 : vector<1x16x1xi1> to vector<10x16x36xi1>
    %56 = vector.broadcast %cst_43 : f32 to vector<10x16x36xf32>
    %57 = arith.select %55, %53, %56 : vector<10x16x36xi1>, vector<10x16x36xf32>
    %cst_44 = arith.constant 0.000000e+00 : f32
    %58 = vector.broadcast %cst_44 : f32 to vector<8x16x4xf32>
    %59 = vector.extract_strided_slice %50 {offsets = [0, 0, 0], sizes = [8, 16, 4], strides = [1, 1, 1]} : vector<10x16x36xf32> to vector<8x16x4xf32>
    %60 = arith.addf %58, %59 : vector<8x16x4xf32>
    %61 = vector.extract_strided_slice %42 {offsets = [0, 0, 4], sizes = [8, 16, 4], strides = [1, 1, 1]} : vector<10x16x36xf32> to vector<8x16x4xf32>
    %62 = arith.addf %60, %61 : vector<8x16x4xf32>
    %63 = vector.extract_strided_slice %57 {offsets = [0, 0, 8], sizes = [8, 16, 4], strides = [1, 1, 1]} : vector<10x16x36xf32> to vector<8x16x4xf32>
    %64 = arith.addf %62, %63 : vector<8x16x4xf32>
    %65 = vector.extract_strided_slice %50 {offsets = [1, 0, 12], sizes = [8, 16, 4], strides = [1, 1, 1]} : vector<10x16x36xf32> to vector<8x16x4xf32>
    %66 = arith.addf %64, %65 : vector<8x16x4xf32>
    %67 = vector.extract_strided_slice %42 {offsets = [1, 0, 16], sizes = [8, 16, 4], strides = [1, 1, 1]} : vector<10x16x36xf32> to vector<8x16x4xf32>
    %68 = arith.addf %66, %67 : vector<8x16x4xf32>
    %69 = vector.extract_strided_slice %57 {offsets = [1, 0, 20], sizes = [8, 16, 4], strides = [1, 1, 1]} : vector<10x16x36xf32> to vector<8x16x4xf32>
    %70 = arith.addf %68, %69 : vector<8x16x4xf32>
    %71 = vector.extract_strided_slice %50 {offsets = [2, 0, 24], sizes = [8, 16, 4], strides = [1, 1, 1]} : vector<10x16x36xf32> to vector<8x16x4xf32>
    %72 = arith.addf %70, %71 : vector<8x16x4xf32>
    %73 = vector.extract_strided_slice %42 {offsets = [2, 0, 28], sizes = [8, 16, 4], strides = [1, 1, 1]} : vector<10x16x36xf32> to vector<8x16x4xf32>
    %74 = arith.addf %72, %73 : vector<8x16x4xf32>
    %75 = vector.extract_strided_slice %57 {offsets = [2, 0, 32], sizes = [8, 16, 4], strides = [1, 1, 1]} : vector<10x16x36xf32> to vector<8x16x4xf32>
    %76 = arith.addf %74, %75 : vector<8x16x4xf32>
    %c0_45 = arith.constant 0 : index
    %c0_46 = arith.constant 0 : index
    %77 = vector.load %arg13[%c0_45, %c0_46] : memref<1x4xf32, #tpu.memory_space<vmem>>, vector<1x4xf32>
    %78 = vector.shape_cast %77 : vector<1x4xf32> to vector<4xf32>
    %79 = vector.shape_cast %78 : vector<4xf32> to vector<1x1x4xf32>
    %80 = vector.broadcast %79 : vector<1x1x4xf32> to vector<8x16x4xf32>
    %81 = arith.addf %76, %80 : vector<8x16x4xf32>
    %82 = arith.addf %7, %81 : vector<8x16x4xf32>
    %cst_47 = arith.constant 0.000000e+00 : f32
    %83 = vector.broadcast %cst_47 : f32 to vector<8x16x4xf32>
    %84 = arith.maximumf %82, %83 : vector<8x16x4xf32>
    %c0_48 = arith.constant 0 : index
    %c0_49 = arith.constant 0 : index
    %c0_50 = arith.constant 0 : index
    %c0_51 = arith.constant 0 : index
    %85 = vector.load %arg14[%c0_48, %c0_49, %c0_50, %c0_51] : memref<1x8x16x4xf32, #tpu.memory_space<vmem>>, vector<1x8x16x4xf32>
    %86 = vector.shape_cast %85 : vector<1x8x16x4xf32> to vector<8x16x4xf32>
    %87 = vector.shape_cast %84 : vector<8x16x4xf32> to vector<1x8x16x4xf32>
    tpu.vector_store %arg14[%c0_48, %c0_49, %c0_50, %c0_51], %87 {strides = array<i32>} : memref<1x8x16x4xf32, #tpu.memory_space<vmem>>, vector<1x8x16x4xf32>,
    return
  }
  func.func @transform_0(%arg0: i32, %arg1: i32) -> (i32, i32, i32, i32) {
    %c8_i32 = arith.constant 8 : i32
    %0 = arith.muli %arg1, %c8_i32 : i32
    %c1_i32 = arith.constant 1 : i32
    %1 = arith.subi %0, %c1_i32 : i32
    %c0_i32 = arith.constant 0 : i32
    %2 = arith.maxsi %1, %c0_i32 : i32
    %c0_i32_0 = arith.constant 0 : i32
    %c0_i32_1 = arith.constant 0 : i32
    %c0_i32_2 = arith.constant 0 : i32
    return %arg0, %2, %c0_i32_0, %c0_i32_1 : i32, i32, i32, i32
  }
  func.func @transform_1(%arg0: i32, %arg1: i32) -> (i32, i32, i32, i32) {
    %c0_i32 = arith.constant 0 : i32
    %c0_i32_0 = arith.constant 0 : i32
    %c0_i32_1 = arith.constant 0 : i32
    return %arg0, %arg1, %c0_i32, %c0_i32_0 : i32, i32, i32, i32
  }
  func.func @transform_2(%arg0: i32, %arg1: i32) -> (i32, i32, i32, i32) {
    %c1_i32 = arith.constant 1 : i32
    %0 = arith.addi %arg1, %c1_i32 : i32
    %c8_i32 = arith.constant 8 : i32
    %1 = arith.muli %0, %c8_i32 : i32
    %c15_i32 = arith.constant 15 : i32
    %2 = arith.minsi %1, %c15_i32 : i32
    %c0_i32 = arith.constant 0 : i32
    %c0_i32_0 = arith.constant 0 : i32
    %c0_i32_1 = arith.constant 0 : i32
    return %arg0, %2, %c0_i32, %c0_i32_0 : i32, i32, i32, i32
  }
  func.func @transform_3(%arg0: i32, %arg1: i32) -> (i32, i32, i32, i32) {
    %c8_i32 = arith.constant 8 : i32
    %0 = arith.muli %arg1, %c8_i32 : i32
    %c1_i32 = arith.constant 1 : i32
    %1 = arith.subi %0, %c1_i32 : i32
    %c0_i32 = arith.constant 0 : i32
    %2 = arith.maxsi %1, %c0_i32 : i32
    %c0_i32_0 = arith.constant 0 : i32
    %c0_i32_1 = arith.constant 0 : i32
    %c0_i32_2 = arith.constant 0 : i32
    return %arg0, %2, %c0_i32_0, %c0_i32_1 : i32, i32, i32, i32
  }
  func.func @transform_4(%arg0: i32, %arg1: i32) -> (i32, i32, i32, i32) {
    %c0_i32 = arith.constant 0 : i32
    %c0_i32_0 = arith.constant 0 : i32
    %c0_i32_1 = arith.constant 0 : i32
    return %arg0, %arg1, %c0_i32, %c0_i32_0 : i32, i32, i32, i32
  }
  func.func @transform_5(%arg0: i32, %arg1: i32) -> (i32, i32, i32, i32) {
    %c1_i32 = arith.constant 1 : i32
    %0 = arith.addi %arg1, %c1_i32 : i32
    %c8_i32 = arith.constant 8 : i32
    %1 = arith.muli %0, %c8_i32 : i32
    %c15_i32 = arith.constant 15 : i32
    %2 = arith.minsi %1, %c15_i32 : i32
    %c0_i32 = arith.constant 0 : i32
    %c0_i32_0 = arith.constant 0 : i32
    %c0_i32_1 = arith.constant 0 : i32
    return %arg0, %2, %c0_i32, %c0_i32_0 : i32, i32, i32, i32
  }
  func.func @transform_6(%arg0: i32, %arg1: i32) -> (i32, i32, i32, i32) {
    %c8_i32 = arith.constant 8 : i32
    %0 = arith.muli %arg1, %c8_i32 : i32
    %c1_i32 = arith.constant 1 : i32
    %1 = arith.subi %0, %c1_i32 : i32
    %c0_i32 = arith.constant 0 : i32
    %2 = arith.maxsi %1, %c0_i32 : i32
    %c0_i32_0 = arith.constant 0 : i32
    %c0_i32_1 = arith.constant 0 : i32
    %c0_i32_2 = arith.constant 0 : i32
    return %arg0, %2, %c0_i32_0, %c0_i32_1 : i32, i32, i32, i32
  }
  func.func @transform_7(%arg0: i32, %arg1: i32) -> (i32, i32, i32, i32) {
    %c0_i32 = arith.constant 0 : i32
    %c0_i32_0 = arith.constant 0 : i32
    %c0_i32_1 = arith.constant 0 : i32
    return %arg0, %arg1, %c0_i32, %c0_i32_0 : i32, i32, i32, i32
  }
  func.func @transform_8(%arg0: i32, %arg1: i32) -> (i32, i32, i32, i32) {
    %c1_i32 = arith.constant 1 : i32
    %0 = arith.addi %arg1, %c1_i32 : i32
    %c8_i32 = arith.constant 8 : i32
    %1 = arith.muli %0, %c8_i32 : i32
    %c15_i32 = arith.constant 15 : i32
    %2 = arith.minsi %1, %c15_i32 : i32
    %c0_i32 = arith.constant 0 : i32
    %c0_i32_0 = arith.constant 0 : i32
    %c0_i32_1 = arith.constant 0 : i32
    return %arg0, %2, %c0_i32, %c0_i32_0 : i32, i32, i32, i32
  }
  func.func @transform_9(%arg0: i32, %arg1: i32) -> (i32, i32) {
    %c0_i32 = arith.constant 0 : i32
    %c0_i32_0 = arith.constant 0 : i32
    %c0_i32_1 = arith.constant 0 : i32
    return %c0_i32, %c0_i32_0 : i32, i32
  }
  func.func @transform_10(%arg0: i32, %arg1: i32) -> (i32, i32) {
    %c0_i32 = arith.constant 0 : i32
    %c0_i32_0 = arith.constant 0 : i32
    %c0_i32_1 = arith.constant 0 : i32
    return %c0_i32, %c0_i32_0 : i32, i32
  }
  func.func @transform_11(%arg0: i32, %arg1: i32) -> (i32, i32) {
    %c0_i32 = arith.constant 0 : i32
    %c0_i32_0 = arith.constant 0 : i32
    %c0_i32_1 = arith.constant 0 : i32
    return %c0_i32, %c0_i32_0 : i32, i32
  }
  func.func @transform_12(%arg0: i32, %arg1: i32) -> (i32, i32, i32, i32) {
    %c0_i32 = arith.constant 0 : i32
    %c0_i32_0 = arith.constant 0 : i32
    %c0_i32_1 = arith.constant 0 : i32
    return %arg0, %arg1, %c0_i32, %c0_i32_0 : i32, i32, i32, i32
  }
}

</mosaic_0001>

<bundles_post_ra>
// kernel: mfa_forward.1
= control target key start
LH: loop header
LB: loop body
LE: loop exit
PB: predicated region body
PF: predicated region fallthrough
CT: control target
= control target key end

     0   :  { %s2799_s21 = smov 0   ;;  %s2801_s22 = smov 0   ;;  %s3742_s0 = inlined_call_operand.vmem [shape: f32[2,16,16,4], index: 0, kind: input, shape index: {}, may-alias: {0,1,2}]   ;;  %s3743_s1 = inlined_call_operand.vmem [shape: f32[2,16,16,4], index: 1, kind: input, shape index: {}, may-alias: {0,1,2}]   ;;  %s3744_s2 = inlined_call_operand.vmem [shape: f32[2,16,16,4], index: 2, kind: input, shape index: {}, may-alias: {0,1,2}]   ;;  %s3745_s3 = inlined_call_operand.vmem [shape: f32[2,16,16,4], index: 3, kind: input, shape index: {}, may-alias: {3,4,5}]   ;;  %s3746_s4 = inlined_call_operand.vmem [shape: f32[2,16,16,4], index: 4, kind: input, shape index: {}, may-alias: {3,4,5}]   ;;  %s3747_s5 = inlined_call_operand.vmem [shape: f32[2,16,16,4], index: 5, kind: input, shape index: {}, may-alias: {3,4,5}]   ;;  %s3748_s6 = inlined_call_operand.vmem [shape: f32[2,16,16,4], index: 6, kind: input, shape index: {}, may-alias: {6,7,8}]   ;;  %s3749_s7 = inlined_call_operand.vmem [shape: f32[2,16,16,4], index: 7, kind: input, shape index: {}, may-alias: {6,7,8}]   ;;  %s3750_s8 = inlined_call_operand.vmem [shape: f32[2,16,16,4], index: 8, kind: input, shape index: {}, may-alias: {6,7,8}]   ;;  %s3751_s9 = inlined_call_operand.vmem [shape: bf16[4,36], index: 9, kind: input, shape index: {}]   ;;  %s3752_s10 = inlined_call_operand.vmem [shape: bf16[4,36], index: 10, kind: input, shape index: {}]   ;;  %s3753_s11 = inlined_call_operand.vmem [shape: f32[1,4], index: 11, kind: input, shape index: {}]   ;;  %s3754_s12 = inlined_call_operand.vmem [shape: f32[2,16,16,4], index: 12, kind: output, shape index: {}]  }
   0x1   :  { %3758 = sst [smem:[#allocation17_spill]] %s3751_s9  ;;  %s2803_s23 = smov 0  }
   0x2   :  { %3759 = sst [smem:[#allocation18_spill]] %s3752_s10  ;;  %s2805_s24 = smov 0  }
   0x3   :  { %s2807_s25 = smov 0  }
   0x4 LB: > { %s31_s26 = sadd.s32 1, %s2716_s23  ;;  %s34_s27 = sadd.s32 1, %s2720_s24  ;;  %s2724_s25 = sphi %s2807_s25, %s22_s25   ;;  %s2720_s24 = sphi %s2805_s24, %s3795_s24   ;;  %s2716_s23 = sphi %s2803_s23, %s3794_s23   ;;  %s2712_s22 = sphi %s2801_s22, %s3793_s22   ;;  %s2708_s21 = sphi %s2799_s21, %s3792_s21  }
   0x5   : > { %p32_p0 = scmp.ge.s32.totalorder %s31_s26, 2  ;;  %p2420_p1 = scmp.ge.s32.totalorder %s2724_s25, 1 }
   0x6   : > { %p612_p2 = scmp.lt.s32.totalorder %s2724_s25, 5 }
   0x7   : > { %s3797_s26 = smov (%p32_p0, %s31_s26), 0  ;;  %s3799_s27 = smov (!%p32_p0, %s34_s27), %s2720_s24 }
   0x8   : > { %3760 = sst [smem:[#allocation2_spill]] %s3797_s26  ;;  %p613_p3 = pnand %p2420_p1, %p612_p2 }
   0x9   : > { %p36_p4 = scmp.ge.s32.totalorder %s3799_s27, 2 }
   0xa   : > { %616 = sbr.rel (%p613_p3) target bundleno = 636 (0x27c), region = 68 }
   0xb   : > { %s3801_s27 = smov (%p36_p4, %s3799_s27), 0 }
   0xc   : > { %3761 = sst [smem:[#allocation3_spill]] %s3801_s27 }
  0x11   : > { %s3762_s10 = sld [smem:[#allocation18_spill]]  ;;  %vm1074_vm0 = vcmask 1041408   ;;  %s3763_s9 = sld [smem:[#allocation17_spill]]  ;;  %vm1043_vm1 = vcmask 31744  }
  0x12   : > { %s2421_s14 = sshll.u32 %s2708_s21, 3  ;;  %p766_p5 = scmp.lt.s32.totalorder %s2712_s22, 1 }
  0x13   : > { %s2422_s15 = sadd.s32 4294967295, %s2421_s14  ;;  %p782_p8 = scmp.lt.s32.totalorder %s2421_s14, 15 }
  0x14   : > { %p764_p6 = scmp.gt.s32.totalorder %s2422_s15, 0  ;;  %p2423_p7 = scmp.lt.s32.totalorder %s2422_s15, 15 }
  0x15   : > { %s3803_s22 = smov (!%p766_p5, %s2712_s22), 1  ;;  %s2526_s19 = sadd.s32 8, %s2421_s14 }
  0x16   : > { %s3805_s15 = smov (!%p764_p6, %s2422_s15), 0  ;;  %s2838_s16 = sshll.u32 %s3803_s22, 5 }
  0x17   : > { %v1042_v0 = vld [vmem:[%s3762_s10] sm:$0x3]  ;;  %s3807_s15 = smov (!%p2423_p7, %s3805_s15), 15  ;;  %p792_p9 = scmp.lt.s32.totalorder %s2526_s19, 15 }
  0x18   : > { %v1031_v1 = vld [vmem:[%s3763_s9] sm:$0x3]  ;;  %2621 = vmatprep.subr.msk.bf16.mxu1 %vm1074_vm0, %v1042_v0  ;;  %v1076_v2 = vsel %vm1074_vm0, %v1042_v0, 0  ;;  %s783_s17 = scalar_select %p782_p8, %s2421_s14, 15 }
  0x19   : > { %2622 = vmatprep.subr.msk.bf16.mxu0 %vm1074_vm0, %v1031_v1  ;;  %v1222_v3 = vsel %vm1074_vm0, %v1031_v1, 0  ;;  %2558 = vmatpush3.bf16.msra.mxu1 %v1076_v2  ;;  %s2428_s18 = sshll.u32 %s3807_s15, 1  ;;  %s3809_s19 = smov (!%p792_p9, %s2526_s19), 15 }
  0x1a   : > { %2580 = vmatpush3.bf16.msra.mxu0 %v1222_v3  ;;  %s772_s20 = sadd.s32 %s2838_s16, %s2428_s18  ;;  %s2432_s28 = sshll.u32 %s783_s17, 1 }
  0x1b   : > { %s786_s29 = sadd.s32 %s2432_s28, %s2838_s16  ;;  %s2430_s30 = sshll.u32 %s772_s20, 3 }
  0x1c   : > { %s2842_s13 = sshll.u32 %s786_s29, 3  ;;  %s774_s10 = scalar_lea.vmem %s3742_s0, %s2430_s30 }
  0x1d   : > { %s3811_s19 = smov (!%p792_p9, %s3809_s19), 15  ;;  %s2851_s14 = scalar_lea.vmem %s3743_s1, %s2842_s13  ;;  %v931_v7 = vld [vmem:[%s774_s10] sm:$0xff]  ;;  %v932_v8 = vld [vmem:[%s774_s10 + $0x8] sm:$0xff] }
  0x1e   : > { %p909_p10 = scmp.gt.s32.totalorder %s2708_s21, 0  ;;  %s2854_s15 = sshll.u32 %s3811_s19, 1  ;;  %v915_v4 = vld [vmem:[%s2851_s14] sm:$0xff]  ;;  %v916_v5 = vld [vmem:[%s2851_s14 + $0x8] sm:$0xff]  ;;  %v917_v6 = vld [vmem:[%s2851_s14 + $0x10] sm:$0xff] }
  0x1f   : > { %s2860_s20 = scalar_lea.vmem %s3746_s4, %s2842_s13  ;;  %s800_s9 = sadd.s32 %s2854_s15, %s2838_s16  ;;  %v2886_v15 = vld [vmem:[%s2851_s14 + $0x18] sm:$0xff]  ;;  %v919_v37 = vld [vmem:[%s2851_s14 + $0x20] sm:$0xff]  ;;  %v920_v38 = vld [vmem:[%s2851_s14 + $0x28] sm:$0xff] }
  0x20   : > { %s2868_s27 = scalar_lea.vmem %s3749_s7, %s2842_s13  ;;  %s864_s19 = scalar_lea.vmem %s3748_s6, %s2430_s30  ;;  %v943_v9 = vld [vmem:[%s2860_s20] sm:$0xff]  ;;  %v944_v10 = vld [vmem:[%s2860_s20 + $0x8] sm:$0xff]  ;;  %v945_v11 = vld [vmem:[%s2860_s20 + $0x10] sm:$0xff] }
  0x21   : > { %s910_s17 = scalar_select %p909_p10, 1, 0  ;;  %v963_v12 = vld [vmem:[%s2868_s27] sm:$0xff]  ;;  %v964_v13 = vld [vmem:[%s2868_s27 + $0x8] sm:$0xff]  ;;  %v965_v14 = vld [vmem:[%s2868_s27 + $0x10] sm:$0xff]  ;;  %v983_v19 = vmul.f32 %v943_v9, %v915_v4  ;;  %v984_v20 = vmul.f32 %v944_v10, %v916_v5  ;;  %v985_v21 = vmul.f32 %v945_v11, %v917_v6 }
  0x22   : > { %s819_s26 = scalar_lea.vmem %s3745_s3, %s2430_s30  ;;  %v966_v16 = vld [vmem:[%s2868_s27 + $0x18] sm:$0xff]  ;;  %v961_v18 = vld [vmem:[%s864_s19] sm:$0xff]  ;;  %v962_v23 = vld [vmem:[%s864_s19 + $0x8] sm:$0xff]  ;;  %v1003_v26 = vmul.f32 %v963_v12, %v915_v4  ;;  %v1004_v27 = vmul.f32 %v964_v13, %v916_v5  ;;  %v1005_v28 = vmul.f32 %v965_v14, %v917_v6  ;;  %p912_p11 = scmp.lt.s32.totalorder %s2708_s21, 1 }
  0x23   : > { %s911_s29 = scvt.s32.f32 %s910_s17  ;;  %v946_v17 = vld [vmem:[%s2860_s20 + $0x18] sm:$0xff]  ;;  %v941_v24 = vld [vmem:[%s819_s26] sm:$0xff]  ;;  %v942_v25 = vld [vmem:[%s819_s26 + $0x8] sm:$0xff]  ;;  %v1006_v31 = vmul.f32 %v966_v16, %v2886_v15  ;;  %v1022_v41 = vpack.c.bf16 %v984_v20, %v983_v19  ;;  %s2441_s10 = sshll.u32 %s800_s9, 3 }
  0x24   : > { %v986_v32 = vmul.f32 %v946_v17, %v2886_v15  ;;  %v967_v39 = vld [vmem:[%s2868_s27 + $0x20] sm:$0xff]  ;;  %v1033_v40 = vpack.c.bf16 %v1004_v27, %v1003_v26  ;;  %v968_v42 = vld [vmem:[%s2868_s27 + $0x28] sm:$0xff]  ;;  %v921_v49 = vld [vmem:[%s2851_s14 + $0x30] sm:$0xff]  ;;  %s913_s30 = scalar_select %p912_p11, 1, 0 }
  0x25   : > { %v933_v22 = vstv %s911_s29  ;;  %v947_v43 = vld [vmem:[%s2860_s20 + $0x20] sm:$0xff]  ;;  %v948_v44 = vld [vmem:[%s2860_s20 + $0x28] sm:$0xff]  ;;  %v1034_v47 = vpack.c.bf16 %v1006_v31, %v1005_v28  ;;  %v922_v50 = vld [vmem:[%s2851_s14 + $0x38] sm:$0xff]  ;;  %v1007_v55 = vmul.f32 %v967_v39, %v919_v37  ;;  %v1008_v56 = vmul.f32 %v968_v42, %v920_v38  ;;  %s802_s18 = scalar_lea.vmem %s3744_s2, %s2441_s10  ;;  %s892_s21 = scalar_lea.vmem %s3750_s8, %s2441_s10 }
  0x26   : > { %v934_v29 = vmul.f32 %v933_v22, %v931_v7  ;;  %v935_v30 = vmul.f32 %v933_v22, %v932_v8  ;;  %v1023_v48 = vpack.c.bf16 %v986_v32, %v985_v21  ;;  %v969_v51 = vld [vmem:[%s2868_s27 + $0x30] sm:$0xff]  ;;  %v970_v52 = vld [vmem:[%s2868_s27 + $0x38] sm:$0xff]  ;;  %v987_v57 = vmul.f32 %v947_v43, %v919_v37  ;;  %v923_v63 = vld [vmem:[%s2851_s14 + $0x40] sm:$0xff]  ;;  %s914_s22 = scvt.s32.f32 %s913_s30  ;;  %s847_s9 = scalar_lea.vmem %s3747_s5, %s2441_s10 }
  0x27   : > { %v949_v53 = vld [vmem:[%s2860_s20 + $0x30] sm:$0xff]  ;;  %v950_v54 = vld [vmem:[%s2860_s20 + $0x38] sm:$0xff]  ;;  %v988_v58 = vmul.f32 %v948_v44, %v920_v38  ;;  %v1009_v59 = vmul.f32 %v969_v51, %v921_v49  ;;  %v1010_v60 = vmul.f32 %v970_v52, %v922_v50  ;;  %v924_v0 = vld [vmem:[%s2851_s14 + $0x48] sm:$0xff]  ;;  %v1035_v2 = vpack.c.bf16 %v1008_v56, %v1007_v55  ;;  %s2728_s29 = smov 116   ;;  %s2729_s10 = smov 120  }
  0x28   : > { %v1001_v33 = vmul.f32 %v961_v18, %v934_v29  ;;  %v1002_v34 = vmul.f32 %v962_v23, %v935_v30  ;;  %v981_v35 = vmul.f32 %v941_v24, %v934_v29  ;;  %v982_v36 = vmul.f32 %v942_v25, %v935_v30  ;;  %v971_v1 = vld [vmem:[%s2868_s27 + $0x40] sm:$0xff]  ;;  %v972_v4 = vld [vmem:[%s2868_s27 + $0x48] sm:$0xff]  ;;  %v925_v9 = vld [vmem:[%s2851_s14 + $0x50] sm:$0xff]  ;;  %s2730_s30 = smov 108   ;;  %s2732_s19 = smov 104  }
  0x29   : > { %v989_v61 = vmul.f32 %v949_v53, %v921_v49  ;;  %v990_v62 = vmul.f32 %v950_v54, %v922_v50  ;;  %v1024_v3 = vpack.c.bf16 %v988_v58, %v987_v57  ;;  %v951_v5 = vld [vmem:[%s2860_s20 + $0x40] sm:$0xff]  ;;  %v952_v6 = vld [vmem:[%s2860_s20 + $0x48] sm:$0xff]  ;;  %v1036_v7 = vpack.c.bf16 %v1010_v60, %v1009_v59  ;;  %v926_v10 = vld [vmem:[%s2851_s14 + $0x58] sm:$0xff]  ;;  %s2733_s17 = smov 96   ;;  %s3524_s16 = scalar_lea.vmem %s3754_s12, %s2842_s13 }
  0x2a   : > { %v1032_v45 = vpack.c.bf16 %v1002_v34, %v1001_v33  ;;  %v1021_v46 = vpack.c.bf16 %v982_v36, %v981_v35  ;;  %v973_v11 = vld [vmem:[%s2868_s27 + $0x50] sm:$0xff]  ;;  %v974_v12 = vld [vmem:[%s2868_s27 + $0x58] sm:$0xff]  ;;  %v1011_v16 = vmul.f32 %v971_v1, %v923_v63  ;;  %v1012_v17 = vmul.f32 %v972_v4, %v924_v0  ;;  %v927_v26 = vld [vmem:[%s2851_s14 + $0x60] sm:$0xff] }
  0x2b   : > { %v1025_v8 = vpack.c.bf16 %v990_v62, %v989_v61  ;;  %v953_v13 = vld [vmem:[%s2860_s20 + $0x50] sm:$0xff]  ;;  %v954_v14 = vld [vmem:[%s2860_s20 + $0x58] sm:$0xff]  ;;  %v991_v18 = vmul.f32 %v951_v5, %v923_v63  ;;  %v992_v19 = vmul.f32 %v952_v6, %v924_v0  ;;  %v1013_v20 = vmul.f32 %v973_v11, %v925_v9  ;;  %v928_v27 = vld [vmem:[%s2851_s14 + $0x68] sm:$0xff] }
  0x2c   : > { %2559 = vmatprep.mubr.msk.bf16.mxu1 %vm1043_vm1, %v1032_v45  ;;  %2581 = vmatprep.mubr.msk.bf16.mxu0 %vm1043_vm1, %v1021_v46  ;;  %v1014_v21 = vmul.f32 %v974_v12, %v926_v10  ;;  %v993_v22 = vmul.f32 %v953_v13, %v925_v9  ;;  %v994_v23 = vmul.f32 %v954_v14, %v926_v10  ;;  %v975_v28 = vld [vmem:[%s2868_s27 + $0x60] sm:$0xff]  ;;  %v976_v31 = vld [vmem:[%s2868_s27 + $0x68] sm:$0xff]  ;;  %v938_v42 = vstv %s914_s22  ;;  %v929_v43 = vld [vmem:[%s2851_s14 + $0x70] sm:$0xff]  ;;  %s2731_s22 = smov 100  }
  0x2d   : > { %2560 = vmatmul.mubr.msk.bf16.vlgmr.msra.gmra.mrb[0].mxu1 %vm1043_vm1, %v1033_v40  ;;  %2582 = vmatmul.mubr.msk.bf16.vlgmr.msra.gmra.mrb[0].mxu0 %vm1043_vm1, %v1022_v41  ;;  %v1037_v24 = vpack.c.bf16 %v1012_v17, %v1011_v16  ;;  %v1026_v25 = vpack.c.bf16 %v992_v19, %v991_v18  ;;  %v955_v32 = vld [vmem:[%s2860_s20 + $0x60] sm:$0xff]  ;;  %v956_v33 = vld [vmem:[%s2860_s20 + $0x68] sm:$0xff]  ;;  %v1015_v34 = vmul.f32 %v975_v28, %v927_v26  ;;  %v930_v44 = vld [vmem:[%s2851_s14 + $0x78] sm:$0xff] }
  0x2e   : > { %2563 = vmatprep.mubr.msk.bf16.mxu1 %vm1043_vm1, %v1034_v47  ;;  %2585 = vmatprep.mubr.msk.bf16.mxu0 %vm1043_vm1, %v1023_v48  ;;  %v1038_v29 = vpack.c.bf16 %v1014_v21, %v1013_v20  ;;  %v1027_v30 = vpack.c.bf16 %v994_v23, %v993_v22  ;;  %v1016_v35 = vmul.f32 %v976_v31, %v928_v27  ;;  %v936_v40 = vld [vmem:[%s802_s18] sm:$0xff]  ;;  %v937_v41 = vld [vmem:[%s802_s18 + $0x8] sm:$0xff]  ;;  %v977_v45 = vld [vmem:[%s2868_s27 + $0x70] sm:$0xff] }
  0x2f   : > { %v995_v36 = vmul.f32 %v955_v32, %v927_v26  ;;  %v996_v37 = vmul.f32 %v956_v33, %v928_v27  ;;  %v939_v46 = vmul.f32 %v938_v42, %v936_v40  ;;  %v940_v47 = vmul.f32 %v938_v42, %v937_v41  ;;  %v978_v48 = vld [vmem:[%s2868_s27 + $0x78] sm:$0xff]  ;;  %v957_v50 = vld [vmem:[%s2860_s20 + $0x70] sm:$0xff]  ;;  %v979_v55 = vld [vmem:[%s892_s21] sm:$0xff]  ;;  %s2727_s27 = smov 124  }
  0x30   : > { %v1039_v38 = vpack.c.bf16 %v1016_v35, %v1015_v34  ;;  %v1017_v49 = vmul.f32 %v977_v45, %v929_v43  ;;  %v958_v51 = vld [vmem:[%s2860_s20 + $0x78] sm:$0xff]  ;;  %v1018_v52 = vmul.f32 %v978_v48, %v930_v44  ;;  %v997_v53 = vmul.f32 %v957_v50, %v929_v43  ;;  %v980_v56 = vld [vmem:[%s892_s21 + $0x8] sm:$0xff]  ;;  %v959_v57 = vld [vmem:[%s847_s9] sm:$0xff]  ;;  %s2726_s20 = smov 112  }
  0x31   : > { %v1028_v39 = vpack.c.bf16 %v996_v37, %v995_v36  ;;  %v998_v54 = vmul.f32 %v958_v51, %v930_v44  ;;  %v1019_v58 = vmul.f32 %v979_v55, %v939_v46  ;;  %v1020_v59 = vmul.f32 %v980_v56, %v940_v47  ;;  %v960_v60 = vld [vmem:[%s847_s9 + $0x8] sm:$0xff] }
  0x32   : > { %v999_v61 = vmul.f32 %v959_v57, %v939_v46  ;;  %v1040_v62 = vpack.c.bf16 %v1018_v52, %v1017_v49  ;;  %v1000_v0 = vmul.f32 %v960_v60, %v940_v47 }
  0x33   : > { %v1029_v63 = vpack.c.bf16 %v998_v54, %v997_v53  ;;  %v1041_v1 = vpack.c.bf16 %v1020_v59, %v1019_v58 }
  0x35   : > { %2564 = vmatmul.mubr.msk.bf16.gmra.mrb[4].mxu1 %vm1043_vm1, %v1035_v2  ;;  %2586 = vmatmul.mubr.msk.bf16.gmra.mrb[4].mxu0 %vm1043_vm1, %v1024_v3  ;;  %v1030_v2 = vpack.c.bf16 %v1000_v0, %v999_v61  ;;  %v1337_v3 = vlaneseq }
  0x36   : > { %2567 = vmatprep.mubr.msk.bf16.mxu1 %vm1043_vm1, %v1036_v7  ;;  %2589 = vmatprep.mubr.msk.bf16.mxu0 %vm1043_vm1, %v1025_v8 }
  0x37   : > { %v2961_v6 = vshrl.u32 %v1337_v3, 7 }
  0x39   : > { %vm1362_vm2 = vcmp.lt.s32.totalorder %v2961_v6, 1  ;;  %vm1429_vm3 = vcmp.lt.s32.totalorder %v2961_v6, 7  ;;  %v3004_v42 = vadd.s32 8, %v2961_v6  ;;  %vm1340_vm5 = vcmp.ge.s32.totalorder %v2961_v6, 1 }
  0x3b   : > { %vm1408_vm4 = vcmp.le.s32.totalorder %v3004_v42, 14 }
  0x3d   : > { %2568 = vmatmul.mubr.msk.bf16.gmra.mrb[8].mxu1 %vm1043_vm1, %v1037_v24  ;;  %2590 = vmatmul.mubr.msk.bf16.gmra.mrb[8].mxu0 %vm1043_vm1, %v1026_v25 }
  0x3e   : > { %2571 = vmatprep.mubr.msk.bf16.mxu1 %vm1043_vm1, %v1038_v29  ;;  %2593 = vmatprep.mubr.msk.bf16.mxu0 %vm1043_vm1, %v1027_v30 }
  0x45   : > { %2572 = vmatmul.mubr.msk.bf16.gmra.mrb[12].mxu1 %vm1043_vm1, %v1039_v38  ;;  %2594 = vmatmul.mubr.msk.bf16.gmra.mrb[12].mxu0 %vm1043_vm1, %v1028_v39 }
  0x46   : > { %2575 = vmatprep.mubr.msk.bf16.mxu1 %vm1043_vm1, %v1040_v62  ;;  %2597 = vmatprep.mubr.msk.bf16.mxu0 %vm1043_vm1, %v1029_v63 }
  0x4d   : > { %2576 = vmatmul.mubr.msk.bf16.gmra.mrb[16].mxu1 %vm1043_vm1, %v1041_v1  ;;  %2598 = vmatmul.mubr.msk.bf16.gmra.mrb[16].mxu0 %vm1043_vm1, %v1030_v2 }
 0x100   : > { %v2561_v4 = vpop.f32.mrb[0].mxu1  ;;  %v2583_v5 = vpop.f32.mrb[0].mxu0 }
 0x101   : > { %v1267_v7 = vadd.f32 %v2583_v5, %v2561_v4  ;;  %v1112_v8 = vpop.f32.mrb[1].mxu1  ;;  %v1258_v9 = vpop.f32.mrb[1].mxu0 }
 0x102   : > { %v1259_v10 = vadd.f32 %v1258_v9, %v1112_v8  ;;  %v2562_v11 = vpop.f32.mrb[2].mxu1  ;;  %v2584_v12 = vpop.f32.mrb[2].mxu0 }
 0x103   : > { %v1270_v13 = vadd.f32 %v2584_v12, %v2562_v11  ;;  %v1115_v14 = vpop.f32.mrb[3].mxu1  ;;  %1732 = vrot.lane.b32.xlu0 %v1267_v7, %s2726_s20  ;;  %1510 = vrot.lane.b32.xlu1 %v1267_v7, %s2727_s27  ;;  %v1261_v16 = vpop.f32.mrb[3].mxu0  ;;  %v1343_v18 = vrot.slane %v1267_v7, 7  ;;  %v1410_v20 = vrot.slane %v1267_v7, 1 }
 0x104   : > { %v1262_v17 = vadd.f32 %v1261_v16, %v1115_v14  ;;  %v1409_v22 = vrot.slane %v1259_v10, 1  ;;  %v1342_v25 = vrot.slane %v1259_v10, 7 }
 0x105   : > { %v1353_v19 = vrot.slane %v1270_v13, 7  ;;  %v1420_v21 = vrot.slane %v1270_v13, 1 }
 0x106   : > { %v1352_v23 = vrot.slane %v1262_v17, 7  ;;  %v1419_v24 = vrot.slane %v1262_v17, 1 }
 0x107   : > { %1512 = vrot.lane.b32.xlu1 %v1270_v13, %s2727_s27  ;;  %1506 = vrot.lane.b32.xlu0 %v1259_v10, %s2727_s27  ;;  %v2971_v26 = vsel %vm1362_vm2, %v1343_v18, %v1353_v19  ;;  %v1431_v27 = vsel %vm1429_vm3, %v1410_v20, %v1420_v21  ;;  %v1441_v28 = vsel %vm1429_vm3, %v1420_v21, %v1410_v20 }
 0x108   : > { %v2565_v29 = vpop.f32.mrb[4].mxu1  ;;  %v2587_v30 = vpop.f32.mrb[4].mxu0  ;;  %v2979_v31 = vsel %vm1429_vm3, %v1409_v22, %v1419_v24  ;;  %v2983_v32 = vsel %vm1429_vm3, %v1419_v24, %v1409_v22  ;;  %v2987_v33 = vsel %vm1362_vm2, %v1353_v19, %v1343_v18  ;;  %v2993_v37 = vsel %vm1362_vm2, %v1352_v23, %v1342_v25 }
 0x109   : > { %v2989_v34 = vadd.f32 %v2587_v30, %v2565_v29  ;;  %v1128_v35 = vpop.f32.mrb[5].mxu1  ;;  %v1274_v36 = vpop.f32.mrb[5].mxu0  ;;  %v2999_v41 = vsel %vm1362_vm2, %v1342_v25, %v1352_v23  ;;  %v1457_v4 = vsel %vm1408_vm4, %v1441_v28, 0.0 }
 0x10a   : > { %v2995_v38 = vadd.f32 %v1274_v36, %v1128_v35  ;;  %v2566_v39 = vpop.f32.mrb[6].mxu1  ;;  %v2588_v40 = vpop.f32.mrb[6].mxu0 }
 0x10b   : > { %1734 = vrot.lane.b32.xlu1 %v1270_v13, %s2726_s20  ;;  %1508 = vrot.lane.b32.xlu0 %v1262_v17, %s2727_s27  ;;  %v3006_v43 = vadd.f32 %v2588_v40, %v2566_v39  ;;  %v1131_v44 = vpop.f32.mrb[7].mxu1  ;;  %v1277_v45 = vpop.f32.mrb[7].mxu0  ;;  %v1345_v46 = vrot.slane %v2989_v34, 7  ;;  %v1412_v47 = vrot.slane %v2989_v34, 1 }
 0x10c   : > { %v3010_v48 = vadd.f32 %v1277_v45, %v1131_v44  ;;  %v1344_v49 = vrot.slane %v2995_v38, 7  ;;  %v1411_v50 = vrot.slane %v2995_v38, 1  ;;  %v1455_v44 = vsel %vm1408_vm4, %v2983_v32, 0.0 }
 0x10d   : > { %v1355_v51 = vrot.slane %v3006_v43, 7  ;;  %v1422_v52 = vrot.slane %v3006_v43, 1  ;;  %v3118_v45 = vsel %vm1340_vm5, %v2987_v33, 0.0 }
 0x10e   : > { %v1354_v53 = vrot.slane %v3010_v48, 7  ;;  %v1421_v54 = vrot.slane %v3010_v48, 1 }
 0x10f   : > { %1668 = vrot.lane.b32.xlu1 %v2971_v26, %s2728_s29  ;;  %1590 = vrot.lane.b32.xlu0 %v1431_v27, %s2729_s10  ;;  %v3024_v55 = vsel %vm1362_vm2, %v1345_v46, %v1355_v51  ;;  %v3028_v56 = vsel %vm1429_vm3, %v1412_v47, %v1422_v52  ;;  %v3032_v57 = vsel %vm1429_vm3, %v1422_v52, %v1412_v47 }
 0x110   : > { %3764 = vst [vmem:[#allocation4_spill] sm:$0xff] %v3024_v55  ;;  %v3036_v58 = vsel %vm1362_vm2, %v1344_v49, %v1354_v53  ;;  %v3040_v59 = vsel %vm1429_vm3, %v1411_v50, %v1421_v54  ;;  %v3044_v60 = vsel %vm1362_vm2, %v1355_v51, %v1345_v46  ;;  %v2569_v61 = vpop.f32.mrb[8].mxu1  ;;  %v2591_v62 = vpop.f32.mrb[8].mxu0  ;;  %v3048_v63 = vsel %vm1429_vm3, %v1421_v54, %v1411_v50 }
 0x111   : > { %v3050_v0 = vadd.f32 %v2591_v62, %v2569_v61  ;;  %v3054_v1 = vsel %vm1362_vm2, %v1354_v53, %v1344_v49  ;;  %v1144_v2 = vpop.f32.mrb[9].mxu1  ;;  %v1290_v3 = vpop.f32.mrb[9].mxu0 }
 0x112   : > { %v3058_v5 = vadd.f32 %v1290_v3, %v1144_v2  ;;  %v2570_v7 = vpop.f32.mrb[10].mxu1  ;;  %v2592_v8 = vpop.f32.mrb[10].mxu0 }
 0x113   : > { %1592 = vrot.lane.b32.xlu1 %v1457_v4, %s2729_s10  ;;  %1798 = vrot.lane.b32.xlu0 %v1431_v27, %s2730_s30  ;;  %v3062_v9 = vadd.f32 %v2592_v8, %v2570_v7  ;;  %v1147_v10 = vpop.f32.mrb[11].mxu1  ;;  %v1293_v11 = vpop.f32.mrb[11].mxu0  ;;  %v1347_v12 = vrot.slane %v3050_v0, 7  ;;  %v1414_v13 = vrot.slane %v3050_v0, 1 }
 0x114   : > { %v3066_v14 = vadd.f32 %v1293_v11, %v1147_v10  ;;  %v1346_v16 = vrot.slane %v3058_v5, 7  ;;  %v1413_v17 = vrot.slane %v3058_v5, 1 }
 0x115   : > { %v1357_v18 = vrot.slane %v3062_v9, 7  ;;  %v1424_v19 = vrot.slane %v3062_v9, 1 }
 0x116   : > { %v1356_v20 = vrot.slane %v3066_v14, 7  ;;  %v1423_v21 = vrot.slane %v3066_v14, 1 }
 0x117   : > { %1800 = vrot.lane.b32.xlu1 %v1457_v4, %s2730_s30  ;;  %1586 = vrot.lane.b32.xlu0 %v2979_v31, %s2729_s10  ;;  %v3080_v22 = vsel %vm1362_vm2, %v1347_v12, %v1357_v18  ;;  %v3084_v23 = vsel %vm1429_vm3, %v1414_v13, %v1424_v19  ;;  %v3088_v24 = vsel %vm1429_vm3, %v1424_v19, %v1414_v13 }
 0x118   : > { %v3092_v25 = vsel %vm1362_vm2, %v1346_v16, %v1356_v20  ;;  %v3096_v27 = vsel %vm1429_vm3, %v1413_v17, %v1423_v21  ;;  %v3100_v28 = vsel %vm1362_vm2, %v1357_v18, %v1347_v12  ;;  %v2573_v29 = vpop.f32.mrb[12].mxu1  ;;  %v2595_v30 = vpop.f32.mrb[12].mxu0  ;;  %v3104_v31 = vsel %vm1429_vm3, %v1423_v21, %v1413_v17 }
 0x119   : > { %3765 = vst [vmem:[#allocation5_spill] sm:$0xff] %v3092_v25  ;;  %v3106_v35 = vadd.f32 %v2595_v30, %v2573_v29  ;;  %v3110_v36 = vsel %vm1362_vm2, %v1356_v20, %v1346_v16  ;;  %v1160_v39 = vpop.f32.mrb[13].mxu1  ;;  %v1306_v40 = vpop.f32.mrb[13].mxu0 }
 0x11a   : > { %v3120_v46 = vadd.f32 %v1306_v40, %v1160_v39  ;;  %v2574_v47 = vpop.f32.mrb[14].mxu1  ;;  %v2596_v49 = vpop.f32.mrb[14].mxu0 }
 0x11b   : > { %1588 = vrot.lane.b32.xlu1 %v1455_v44, %s2729_s10  ;;  %1666 = vrot.lane.b32.xlu0 %v3118_v45, %s2728_s29  ;;  %v3125_v50 = vadd.f32 %v2596_v49, %v2574_v47  ;;  %v1163_v51 = vpop.f32.mrb[15].mxu1  ;;  %v1309_v52 = vpop.f32.mrb[15].mxu0  ;;  %v1349_v32 = vrot.slane %v3106_v35, 7  ;;  %v1416_v54 = vrot.slane %v3106_v35, 1 }
 0x11c   : > { %v3127_v53 = vadd.f32 %v1309_v52, %v1163_v51  ;;  %v1348_v62 = vrot.slane %v3120_v46, 7  ;;  %v1415_v3 = vrot.slane %v3120_v46, 1 }
 0x11d   : > { %v1359_v33 = vrot.slane %v3125_v50, 7  ;;  %v1426_v61 = vrot.slane %v3125_v50, 1 }
 0x11e   : > { %v1358_v2 = vrot.slane %v3127_v53, 7  ;;  %v1425_v4 = vrot.slane %v3127_v53, 1 }
 0x11f   : > { %1520 = vrot.lane.b32.xlu1 %v3006_v43, %s2727_s27  ;;  %1518 = vrot.lane.b32.xlu0 %v2989_v34, %s2727_s27  ;;  %v3143_v7 = vsel %vm1362_vm2, %v1349_v32, %v1359_v33  ;;  %v3147_v8 = vsel %vm1429_vm3, %v1416_v54, %v1426_v61  ;;  %v3151_v10 = vsel %vm1429_vm3, %v1426_v61, %v1416_v54 }
 0x120   : > { %v3155_v11 = vsel %vm1362_vm2, %v1359_v33, %v1349_v32  ;;  %v3159_v12 = vsel %vm1362_vm2, %v1348_v62, %v1358_v2  ;;  %v3163_v13 = vsel %vm1429_vm3, %v1415_v3, %v1425_v4  ;;  %v3171_v16 = vsel %vm1429_vm3, %v1425_v4, %v1415_v3 }
 0x121   : > { %v3175_v17 = vsel %vm1362_vm2, %v1358_v2, %v1348_v62 }
 0x123   : > { %1742 = vrot.lane.b32.xlu1 %v3006_v43, %s2726_s20  ;;  %1740 = vrot.lane.b32.xlu0 %v2989_v34, %s2726_s20 }
 0x127   : > { %1936 = vrot.lane.b32.xlu1 %v3006_v43, %s2731_s22  ;;  %1934 = vrot.lane.b32.xlu0 %v2989_v34, %s2731_s22  ;;  %v1461_v34 = vsel %vm1408_vm4, %v3032_v57, 0.0  ;;  %v1459_v43 = vsel %vm1408_vm4, %v3048_v63, 0.0  ;;  %v2599_v57 = vpop.f32.mrb[16].mxu0 }
 0x128   : > { %v1322_v18 = vpop.f32.mrb[17].mxu0 }
 0x129   : > { %v2600_v63 = vpop.f32.mrb[18].mxu0 }
 0x12a   : > { %v1325_v29 = vpop.f32.mrb[19].mxu0 }
 0x12b   : > { %1516 = vrot.lane.b32.xlu1 %v3010_v48, %s2727_s27  ;;  %1514 = vrot.lane.b32.xlu0 %v2995_v38, %s2727_s27 }
 0x12f   : > { %1738 = vrot.lane.b32.xlu1 %v3010_v48, %s2726_s20  ;;  %1736 = vrot.lane.b32.xlu0 %v2995_v38, %s2726_s20 }
 0x133   : > { %1932 = vrot.lane.b32.xlu1 %v3010_v48, %s2731_s22  ;;  %1930 = vrot.lane.b32.xlu0 %v2995_v38, %s2731_s22  ;;  %v3214_v38 = vsel %vm1340_vm5, %v3044_v60, 0.0  ;;  %v3235_v48 = vsel %vm1340_vm5, %v3054_v1, 0.0 }
 0x134   : > { %3766 = vst [vmem:[#allocation6_spill] sm:$0xff] %v3214_v38 }
 0x137   : > { %1676 = vrot.lane.b32.xlu1 %v3024_v55, %s2728_s29  ;;  %1598 = vrot.lane.b32.xlu0 %v3028_v56, %s2729_s10 }
 0x13b   : > { %1870 = vrot.lane.b32.xlu1 %v3024_v55, %s2732_s19  ;;  %1806 = vrot.lane.b32.xlu0 %v3028_v56, %s2730_s30 }
 0x13f   : > { %1600 = vrot.lane.b32.xlu1 %v1461_v34, %s2729_s10  ;;  %2000 = vrot.lane.b32.xlu0 %v3028_v56, %s2733_s17  ;;  %v2577_v56 = vpop.f32.mrb[16].mxu1 }
 0x140   : > { %v1176_v60 = vpop.f32.mrb[17].mxu1  ;;  %v3243_v19 = vadd.f32 %v2599_v57, %v2577_v56  ;;  %v1465_v57 = vsel %vm1408_vm4, %v3088_v24, 0.0  ;;  %v3356_v24 = vsel %vm1340_vm5, %v3100_v28, 0.0 }
 0x141   : > { %v3245_v1 = vadd.f32 %v1322_v18, %v1176_v60 }
 0x142   : > { %v1351_v39 = vrot.slane %v3243_v19, 7  ;;  %v1418_v40 = vrot.slane %v3243_v19, 1 }
 0x143   : > { %1672 = vrot.lane.b32.xlu1 %v3036_v58, %s2728_s29  ;;  %1594 = vrot.lane.b32.xlu0 %v3040_v59, %s2729_s10  ;;  %v1417_v49 = vrot.slane %v3245_v1, 1  ;;  %v1350_v52 = vrot.slane %v3245_v1, 7 }
 0x147   : > { %1808 = vrot.lane.b32.xlu1 %v1461_v34, %s2730_s30  ;;  %1674 = vrot.lane.b32.xlu0 %v3214_v38, %s2728_s29 }
 0x14b   : > { %1866 = vrot.lane.b32.xlu1 %v3036_v58, %s2732_s19  ;;  %1802 = vrot.lane.b32.xlu0 %v3040_v59, %s2730_s30 }
 0x14f   : > { %2002 = vrot.lane.b32.xlu1 %v1461_v34, %s2733_s17  ;;  %1868 = vrot.lane.b32.xlu0 %v3214_v38, %s2732_s19 }
 0x153   : > { %1596 = vrot.lane.b32.xlu1 %v1459_v43, %s2729_s10  ;;  %1996 = vrot.lane.b32.xlu0 %v3040_v59, %s2733_s17  ;;  %v2578_v59 = vpop.f32.mrb[18].mxu1 }
 0x154   : > { %v3247_v20 = vadd.f32 %v2600_v63, %v2578_v59  ;;  %v1179_v21 = vpop.f32.mrb[19].mxu1 }
 0x155   : > { %v3249_v30 = vadd.f32 %v1325_v29, %v1179_v21 }
 0x156   : > { %v1361_v44 = vrot.slane %v3247_v20, 7  ;;  %v1428_v47 = vrot.slane %v3247_v20, 1 }
 0x157   : > { %1804 = vrot.lane.b32.xlu1 %v1459_v43, %s2730_s30  ;;  %1670 = vrot.lane.b32.xlu0 %v3235_v48, %s2728_s29  ;;  %v1427_v51 = vrot.slane %v3249_v30, 1  ;;  %v1360_v32 = vrot.slane %v3249_v30, 7 }
 0x158   : > { %v3265_v33 = vsel %vm1362_vm2, %v1351_v39, %v1361_v44  ;;  %v3277_v62 = vsel %vm1362_vm2, %v1361_v44, %v1351_v39  ;;  %v3289_v4 = vsel %vm1429_vm3, %v1428_v47, %v1418_v40  ;;  %v3297_v34 = vsel %vm1429_vm3, %v1418_v40, %v1428_v47 }
 0x159   : > { %v3269_v54 = vsel %vm1429_vm3, %v1417_v49, %v1427_v51  ;;  %v3273_v61 = vsel %vm1362_vm2, %v1350_v52, %v1360_v32  ;;  %v3281_v2 = vsel %vm1362_vm2, %v1360_v32, %v1350_v52  ;;  %v3285_v3 = vsel %vm1429_vm3, %v1427_v51, %v1417_v49  ;;  %3767 = vst [vmem:[#allocation7_spill] sm:$0xff] %v3289_v4 }
 0x15a   : > { %3768 = vst [vmem:[#allocation8_spill] sm:$0xff] %v3297_v34  ;;  %v1463_v44 = vsel %vm1408_vm4, %v3104_v31, 0.0  ;;  %v3391_v51 = vsel %vm1340_vm5, %v3110_v36, 0.0 }
 0x15b   : > { %1998 = vrot.lane.b32.xlu1 %v1459_v43, %s2733_s17  ;;  %1864 = vrot.lane.b32.xlu0 %v3235_v48, %s2732_s19 }
 0x15f   : > { %1528 = vrot.lane.b32.xlu1 %v3062_v9, %s2727_s27  ;;  %1526 = vrot.lane.b32.xlu0 %v3050_v0, %s2727_s27 }
 0x163   : > { %1750 = vrot.lane.b32.xlu1 %v3062_v9, %s2726_s20  ;;  %1748 = vrot.lane.b32.xlu0 %v3050_v0, %s2726_s20 }
 0x167   : > { %1944 = vrot.lane.b32.xlu1 %v3062_v9, %s2731_s22  ;;  %1942 = vrot.lane.b32.xlu0 %v3050_v0, %s2731_s22 }
 0x16b   : > { %1524 = vrot.lane.b32.xlu1 %v3066_v14, %s2727_s27  ;;  %1522 = vrot.lane.b32.xlu0 %v3058_v5, %s2727_s27 }
 0x16f   : > { %1746 = vrot.lane.b32.xlu1 %v3066_v14, %s2726_s20  ;;  %1744 = vrot.lane.b32.xlu0 %v3058_v5, %s2726_s20 }
 0x173   : > { %1940 = vrot.lane.b32.xlu1 %v3066_v14, %s2731_s22  ;;  %1938 = vrot.lane.b32.xlu0 %v3058_v5, %s2731_s22 }
 0x175   : > { %v3315_v9 = vpop.permute.xlu0 %1732  ;;  %v3317_v0 = vpop.permute.xlu1 %1510 }
 0x177   : > { %1684 = vrot.lane.b32.xlu1 %v3080_v22, %s2728_s29  ;;  %1606 = vrot.lane.b32.xlu0 %v3084_v23, %s2729_s10 }
 0x179   : > { %v3323_v43 = vpop.permute.xlu1 %1512  ;;  %v3325_v56 = vpop.permute.xlu0 %1506 }
 0x17b   : > { %1878 = vrot.lane.b32.xlu1 %v3080_v22, %s2732_s19  ;;  %1814 = vrot.lane.b32.xlu0 %v3084_v23, %s2730_s30 }
 0x17d   : > { %v3331_v5 = vpop.permute.xlu1 %1734  ;;  %v3333_v14 = vpop.permute.xlu0 %1508 }
 0x17f   : > { %1608 = vrot.lane.b32.xlu1 %v1465_v57, %s2729_s10  ;;  %2008 = vrot.lane.b32.xlu0 %v3084_v23, %s2733_s17 }
 0x181   : > { %v3341_v60 = vpop.permute.xlu1 %1668  ;;  %v3343_v18 = vpop.permute.xlu0 %1590 }
 0x183   : > { %1680 = vrot.lane.b32.xlu1 %v3092_v25, %s2728_s29  ;;  %1602 = vrot.lane.b32.xlu0 %v3096_v27, %s2729_s10 }
 0x185   : > { %v3349_v59 = vpop.permute.xlu1 %1592  ;;  %v3351_v63 = vpop.permute.xlu0 %1798 }
 0x187   : > { %1816 = vrot.lane.b32.xlu1 %v1465_v57, %s2730_s30  ;;  %1682 = vrot.lane.b32.xlu0 %v3356_v24, %s2728_s29 }
 0x189   : > { %v3361_v23 = vpop.permute.xlu1 %1800  ;;  %v3363_v21 = vpop.permute.xlu0 %1586 }
 0x18b   : > { %1874 = vrot.lane.b32.xlu1 %v3092_v25, %s2732_s19  ;;  %1810 = vrot.lane.b32.xlu0 %v3096_v27, %s2730_s30 }
 0x18d   : > { %v1589_v29 = vpop.permute.xlu1 %1588  ;;  %v3369_v39 = vpop.permute.xlu0 %1666 }
 0x18f   : > { %2010 = vrot.lane.b32.xlu1 %v1465_v57, %s2733_s17  ;;  %1876 = vrot.lane.b32.xlu0 %v3356_v24, %s2732_s19 }
 0x191   : > { %v3374_v28 = vpop.permute.xlu1 %1520  ;;  %v3376_v40 = vpop.permute.xlu0 %1518 }
 0x192   : > { %3769 = vst [vmem:[#allocation9_spill] sm:$0xff] %v3374_v28  ;;  %3770 = vst [vmem:[#allocation10_spill] sm:$0xff] %v3376_v40 }
 0x193   : > { %1604 = vrot.lane.b32.xlu1 %v1463_v44, %s2729_s10  ;;  %2004 = vrot.lane.b32.xlu0 %v3096_v27, %s2733_s17 }
 0x195   : > { %v3384_v47 = vpop.permute.xlu1 %1742  ;;  %v3386_v49 = vpop.permute.xlu0 %1740 }
 0x196   : > { %3771 = vst [vmem:[#allocation11_spill] sm:$0xff] %v3384_v47  ;;  %3772 = vst [vmem:[#allocation12_spill] sm:$0xff] %v3386_v49 }
 0x197   : > { %1812 = vrot.lane.b32.xlu1 %v1463_v44, %s2730_s30  ;;  %1678 = vrot.lane.b32.xlu0 %v3391_v51, %s2728_s29 }
 0x199   : > { %v3396_v31 = vpop.permute.xlu1 %1936  ;;  %v3398_v52 = vpop.permute.xlu0 %1934 }
 0x19b   : > { %2006 = vrot.lane.b32.xlu1 %v1463_v44, %s2733_s17  ;;  %1872 = vrot.lane.b32.xlu0 %v3391_v51, %s2732_s19 }
 0x19d   : > { %v3403_v27 = vpop.permute.xlu1 %1516  ;;  %v1515_v32 = vpop.permute.xlu0 %1514 }
 0x19e   : > { %v1559_v6 = vadd.f32 %v3403_v27, %v3036_v58  ;;  %v3779_v27 = vld [vmem:[#allocation8_spill] sm:$0xff] }
 0x19f   : > { %1536 = vrot.lane.b32.xlu1 %v3125_v50, %s2727_s27  ;;  %1534 = vrot.lane.b32.xlu0 %v3106_v35, %s2727_s27 }
 0x1a1   : > { %v1739_v36 = vpop.permute.xlu1 %1738  ;;  %v3409_v57 = vpop.permute.xlu0 %1736 }
 0x1a3   : > { %1758 = vrot.lane.b32.xlu1 %v3125_v50, %s2726_s20  ;;  %1756 = vrot.lane.b32.xlu0 %v3106_v35, %s2726_s20 }
 0x1a5   : > { %v3415_v44 = vpop.permute.xlu1 %1932  ;;  %v3417_v49 = vpop.permute.xlu0 %1930 }
 0x1a7   : > { %1952 = vrot.lane.b32.xlu1 %v3125_v50, %s2731_s22  ;;  %1950 = vrot.lane.b32.xlu0 %v3106_v35, %s2731_s22 }
 0x1a9   : > { %v3423_v40 = vpop.permute.xlu1 %1676  ;;  %v3425_v38 = vpop.permute.xlu0 %1598 }
 0x1aa   : > { %3773 = vst [vmem:[#allocation13_spill] sm:$0xff] %v3423_v40  ;;  %3774 = vst [vmem:[#allocation14_spill] sm:$0xff] %v3425_v38 }
 0x1ab   : > { %1532 = vrot.lane.b32.xlu1 %v3127_v53, %s2727_s27  ;;  %1530 = vrot.lane.b32.xlu0 %v3120_v46, %s2727_s27 }
 0x1ad   : > { %v1871_v25 = vpop.permute.xlu1 %1870  ;;  %v3431_v47 = vpop.permute.xlu0 %1806 }
 0x1ae   : > { %3775 = vst [vmem:[#allocation15_spill] sm:$0xff] %v3431_v47  ;;  %v1558_v47 = vadd.f32 %v1515_v32, %v3235_v48 }
 0x1af   : > { %1754 = vrot.lane.b32.xlu1 %v3127_v53, %s2726_s20  ;;  %1752 = vrot.lane.b32.xlu0 %v3120_v46, %s2726_s20 }
 0x1b1   : > { %v3437_v35 = vpop.permute.xlu1 %1600  ;;  %v3439_v50 = vpop.permute.xlu0 %2000 }
 0x1b2   : > { %3776 = vst [vmem:[#allocation16_spill] sm:$0xff] %v3437_v35  ;;  %v1555_v35 = vadd.f32 %v3333_v14, %v2999_v41  ;;  %v1469_v41 = vsel %vm1408_vm4, %v3151_v10, 0.0  ;;  %v1387_v14 = vsel %vm1340_vm5, %v2993_v37, 0.0 }
 0x1b3   : > { %1948 = vrot.lane.b32.xlu1 %v3127_v53, %s2731_s22  ;;  %1946 = vrot.lane.b32.xlu0 %v3120_v46, %s2731_s22 }
 0x1b4   : > { %v1635_v4 = vadd.f32 %v1589_v29, %v1555_v35  ;;  %v1554_v29 = vadd.f32 %v3325_v56, %v1387_v14  ;;  %v1556_v56 = vadd.f32 %v3317_v0, %v3118_v45 }
 0x1b5   : > { %v1673_v38 = vpop.permute.xlu1 %1672  ;;  %v1595_v28 = vpop.permute.xlu0 %1594 }
 0x1b6   : > { %v1638_v55 = vadd.f32 %v1595_v28, %v1558_v47  ;;  %v1715_v32 = vadd.f32 %v3341_v60, %v1635_v4  ;;  %v1634_v10 = vadd.f32 %v3363_v21, %v1554_v29 }
 0x1b7   : > { %1692 = vrot.lane.b32.xlu1 %v3143_v7, %s2728_s29  ;;  %1614 = vrot.lane.b32.xlu0 %v3147_v8, %s2729_s10 }
 0x1b8   : > { %v1781_v47 = vadd.f32 %v3331_v5, %v1715_v32  ;;  %v1714_v37 = vadd.f32 %v3369_v39, %v1634_v10  ;;  %v3489_v5 = vsel %vm1340_vm5, %v3155_v11, 0.0 }
 0x1b9   : > { %v3452_v34 = vpop.permute.xlu1 %1808  ;;  %v1675_v53 = vpop.permute.xlu0 %1674 }
 0x1ba   : > { %v3454_v40 = vadd.f32 %v1675_v53, %v1638_v55  ;;  %v1557_v55 = vadd.f32 %v3323_v43, %v2971_v26  ;;  %v1780_v21 = vadd.f32 %v3315_v9, %v1714_v37  ;;  %v3506_v9 = vld [vmem:[%s3753_s11] ss:$0 sm:$0xff] }
 0x1bb   : > { %1886 = vrot.lane.b32.xlu1 %v3143_v7, %s2732_s19  ;;  %1822 = vrot.lane.b32.xlu0 %v3147_v8, %s2730_s30 }
 0x1bc   : > { %v1637_v60 = vadd.f32 %v3349_v59, %v1557_v55  ;;  %v1847_v59 = vadd.f32 %v3361_v23, %v1781_v47 }
 0x1bd   : > { %v1867_v46 = vpop.permute.xlu1 %1866  ;;  %v1803_v48 = vpop.permute.xlu0 %1802 }
 0x1be   : > { %v1913_v39 = vadd.f32 %v1867_v46, %v1847_v59 }
 0x1bf   : > { %1616 = vrot.lane.b32.xlu1 %v1469_v41, %s2729_s10  ;;  %2016 = vrot.lane.b32.xlu0 %v3147_v8, %s2733_s17  ;;  %v1717_v8 = vadd.f32 %v1673_v38, %v1637_v60  ;;  %v1636_v38 = vadd.f32 %v3343_v18, %v1556_v56  ;;  %v1846_v18 = vadd.f32 %v3351_v63, %v1780_v21 }
 0x1c0   : > { %v1979_v14 = vadd.f32 %v3415_v44, %v1913_v39 }
 0x1c1   : > { %v2003_v28 = vpop.permute.xlu1 %2002  ;;  %v1869_v4 = vpop.permute.xlu0 %1868  ;;  %v1783_v35 = vadd.f32 %v1739_v36, %v1717_v8 }
 0x1c3   : > { %1688 = vrot.lane.b32.xlu1 %v3159_v12, %s2728_s29  ;;  %1610 = vrot.lane.b32.xlu0 %v3163_v13, %s2729_s10 }
 0x1c5   : > { %v3481_v26 = vpop.permute.xlu1 %1596  ;;  %v1997_v43 = vpop.permute.xlu0 %1996 }
 0x1c7   : > { %1824 = vrot.lane.b32.xlu1 %v1469_v41, %s2730_s30  ;;  %1690 = vrot.lane.b32.xlu0 %v3489_v5, %s2728_s29 }
 0x1c9   : > { %v1805_v53 = vpop.permute.xlu1 %1804  ;;  %v1671_v45 = vpop.permute.xlu0 %1670 }
 0x1ca   : > { %v1849_v0 = vadd.f32 %v1805_v53, %v1783_v35  ;;  %v1716_v23 = vadd.f32 %v1671_v45, %v1636_v38 }
 0x1cb   : > { %1882 = vrot.lane.b32.xlu1 %v3159_v12, %s2732_s19  ;;  %1818 = vrot.lane.b32.xlu0 %v3163_v13, %s2730_s30 }
 0x1cc   : > { %v1915_v11 = vadd.f32 %v1871_v25, %v1849_v0  ;;  %v1782_v32 = vadd.f32 %v3409_v57, %v1716_v23 }
 0x1cd   : > { %v1999_v36 = vpop.permute.xlu1 %1998  ;;  %v1865_v46 = vpop.permute.xlu0 %1864 }
 0x1ce   : > { %v1981_v55 = vadd.f32 %v3396_v31, %v1915_v11  ;;  %v1848_v29 = vadd.f32 %v1803_v48, %v1782_v32  ;;  %v2045_v60 = vadd.f32 %v1999_v36, %v1979_v14  ;;  %v1912_v25 = vadd.f32 %v1865_v46, %v1846_v18 }
 0x1cf   : > { %2018 = vrot.lane.b32.xlu1 %v1469_v41, %s2733_s17  ;;  %1884 = vrot.lane.b32.xlu0 %v3489_v5, %s2732_s19  ;;  %v1467_v31 = vsel %vm1408_vm4, %v3171_v16, 0.0  ;;  %v2671_v41 = vld [vmem:[%s2851_s14 + $0x8] sm:$0xff] }
 0x1d0   : > { %v2047_v63 = vadd.f32 %v2003_v28, %v1981_v55  ;;  %v1914_v57 = vadd.f32 %v1869_v4, %v1848_v29  ;;  %v2068_v44 = vadd.f32 %v3506_v9, %v2045_v60  ;;  %v1978_v10 = vadd.f32 %v3417_v49, %v1912_v25 }
 0x1d1   : > { %v1529_v47 = vpop.permute.xlu1 %1528  ;;  %v1527_v37 = vpop.permute.xlu0 %1526 }
 0x1d2   : > { %v2070_v48 = vadd.f32 %v3506_v9, %v2047_v63  ;;  %v1980_v8 = vadd.f32 %v3398_v52, %v1914_v57  ;;  %v2084_v56 = vadd.f32 %v2671_v41, %v2068_v44  ;;  %v2044_v59 = vadd.f32 %v1997_v43, %v1978_v10  ;;  %v3778_v41 = vld [vmem:[#allocation7_spill] sm:$0xff] }
 0x1d3   : > { %1612 = vrot.lane.b32.xlu1 %v1467_v31, %s2729_s10  ;;  %2012 = vrot.lane.b32.xlu0 %v3163_v13, %s2733_s17  ;;  %v2672_v13 = vld [vmem:[%s2851_s14] sm:$0xff]  ;;  %v1403_v63 = vsel %vm1340_vm5, %v3281_v2, 0.0 }
 0x1d4   : > { %v2086_v16 = vadd.f32 %v2070_v48, %v2886_v15  ;;  %v2046_v49 = vadd.f32 %v3439_v50, %v1980_v8  ;;  %v2100_v52 = vmax.f32 %v2084_v56, 0.0  ;;  %v2067_v28 = vadd.f32 %v3506_v9, %v2044_v59  ;;  %v2673_v50 = vld [vmem:[%s2851_s14 + $0x10] sm:$0xff]  ;;  %v3777_v48 = vld [vmem:[#allocation13_spill] sm:$0xff] }
 0x1d5   : > { %v3532_v4 = vpop.permute.xlu1 %1750  ;;  %v3534_v43 = vpop.permute.xlu0 %1748  ;;  %v3543_v15 = vsel %vm1340_vm5, %v3175_v17, 0.0  ;;  %v3781_v56 = vld [vmem:[#allocation9_spill] sm:$0xff] }
 0x1d6   : > { %v2102_v38 = vmax.f32 %v2086_v16, 0.0  ;;  %v2069_v21 = vadd.f32 %v3506_v9, %v2046_v49  ;;  %2116 = vst.msk [vmem:[%s3524_s16 + $0x8] sm:$0xff] %vm1043_vm1, %v2100_v52  ;;  %v2083_v39 = vadd.f32 %v2672_v13, %v2067_v28  ;;  %v3782_v52 = vld [vmem:[#allocation16_spill] sm:$0xff] }
 0x1d7   : > { %1820 = vrot.lane.b32.xlu1 %v1467_v31, %s2730_s30  ;;  %1686 = vrot.lane.b32.xlu0 %v3543_v15, %s2728_s29 }
 0x1d8   : > { %2118 = vst.msk [vmem:[%s3524_s16 + $0x18] sm:$0xff] %vm1043_vm1, %v2102_v38  ;;  %v2085_v35 = vadd.f32 %v2673_v50, %v2069_v21  ;;  %v2099_v53 = vmax.f32 %v2083_v39, 0.0  ;;  %v3784_v21 = vld [vmem:[#allocation5_spill] sm:$0xff] }
 0x1d9   : > { %v3551_v45 = vpop.permute.xlu1 %1944  ;;  %v3553_v0 = vpop.permute.xlu0 %1942 }
 0x1da   : > { %v2101_v23 = vmax.f32 %v2085_v35, 0.0  ;;  %2115 = vst.msk [vmem:[%s3524_s16] sm:$0xff] %vm1043_vm1, %v2099_v53  ;;  %v3785_v35 = vld [vmem:[#allocation6_spill] sm:$0xff] }
 0x1db   : > { %2014 = vrot.lane.b32.xlu1 %v1467_v31, %s2733_s17  ;;  %1880 = vrot.lane.b32.xlu0 %v3543_v15, %s2732_s19  ;;  %v3786_v53 = vld [vmem:[#allocation10_spill] sm:$0xff] }
 0x1dc   : > { %2117 = vst.msk [vmem:[%s3524_s16 + $0x10] sm:$0xff] %vm1043_vm1, %v2101_v23  ;;  %v1560_v23 = vadd.f32 %v3786_v53, %v3785_v35 }
 0x1dd   : > { %v1525_v17 = vpop.permute.xlu1 %1524  ;;  %v1523_v11 = vpop.permute.xlu0 %1522 }
 0x1de   : > { %v1563_v13 = vadd.f32 %v1525_v17, %v3784_v21 }
 0x1df   : > { %1960 = vrot.lane.b32.xlu1 %v3247_v20, %s2731_s22  ;;  %1958 = vrot.lane.b32.xlu0 %v3243_v19, %s2731_s22  ;;  %v1564_v19 = vadd.f32 %v1527_v37, %v3356_v24 }
 0x1e1   : > { %v3566_v32 = vpop.permute.xlu1 %1746  ;;  %v3568_v14 = vpop.permute.xlu0 %1744 }
 0x1e3   : > { %1762 = vrot.lane.b32.xlu1 %v3249_v30, %s2726_s20  ;;  %1760 = vrot.lane.b32.xlu0 %v3245_v1, %s2726_s20 }
 0x1e5   : > { %v3574_v18 = vpop.permute.xlu1 %1940  ;;  %v3576_v36 = vpop.permute.xlu0 %1938 }
 0x1e7   : > { %1956 = vrot.lane.b32.xlu1 %v3249_v30, %s2731_s22  ;;  %1954 = vrot.lane.b32.xlu0 %v3245_v1, %s2731_s22  ;;  %v1405_v30 = vsel %vm1340_vm5, %v3277_v62, 0.0  ;;  %v1565_v1 = vadd.f32 %v1529_v47, %v3080_v22  ;;  %v1562_v62 = vadd.f32 %v1523_v11, %v3391_v51  ;;  %v1471_v22 = vsel %vm1408_vm4, %v3285_v3, 0.0 }
 0x1e8   : > { %v1639_v47 = vadd.f32 %v3481_v26, %v1559_v6  ;;  %v3780_v26 = vld [vmem:[#allocation4_spill] sm:$0xff]  ;;  %v3789_v6 = vld [vmem:[#allocation15_spill] sm:$0xff] }
 0x1e9   : > { %v1685_v20 = vpop.permute.xlu1 %1684  ;;  %v1607_v46 = vpop.permute.xlu0 %1606  ;;  %v1561_v59 = vadd.f32 %v3781_v56, %v3780_v26  ;;  %v2675_v56 = vld [vmem:[%s2851_s14 + $0x38] sm:$0xff] }
 0x1ea   : > { %v3583_v55 = vadd.f32 %v1607_v46, %v1564_v19  ;;  %v1719_v8 = vadd.f32 %v3777_v48, %v1639_v47  ;;  %v3787_v46 = vld [vmem:[#allocation12_spill] sm:$0xff] }
 0x1eb   : > { %1894 = vrot.lane.b32.xlu1 %v3265_v33, %s2732_s19  ;;  %1826 = vrot.lane.b32.xlu0 %v3269_v54, %s2730_s30  ;;  %v1641_v28 = vadd.f32 %v3782_v52, %v1561_v59 }
 0x1ed   : > { %v1879_v29 = vpop.permute.xlu1 %1878  ;;  %v1815_v60 = vpop.permute.xlu0 %1814 }
 0x1ef   : > { %1696 = vrot.lane.b32.xlu1 %v3273_v61, %s2728_s29  ;;  %1892 = vrot.lane.b32.xlu0 %v1405_v30, %s2732_s19  ;;  %v3788_v30 = vld [vmem:[#allocation14_spill] sm:$0xff] }
 0x1f1   : > { %v1609_v24 = vpop.permute.xlu1 %1608  ;;  %v3596_v25 = vpop.permute.xlu0 %2008 }
 0x1f2   : > { %v3598_v33 = vadd.f32 %v1609_v24, %v1565_v1  ;;  %v1640_v1 = vadd.f32 %v3788_v30, %v1560_v23 }
 0x1f3   : > { %1890 = vrot.lane.b32.xlu1 %v3273_v61, %s2732_s19  ;;  %1694 = vrot.lane.b32.xlu0 %v1403_v63, %s2728_s29 }
 0x1f5   : > { %v1681_v57 = vpop.permute.xlu1 %1680  ;;  %v1603_v44 = vpop.permute.xlu0 %1602 }
 0x1f6   : > { %v1642_v10 = vadd.f32 %v1603_v44, %v1562_v62  ;;  %v1721_v42 = vadd.f32 %v1681_v57, %v1641_v28 }
 0x1f7   : > { %1828 = vrot.lane.b32.xlu1 %v1471_v22, %s2730_s30  ;;  %2020 = vrot.lane.b32.xlu0 %v3269_v54, %s2733_s17  ;;  %v1473_v54 = vsel %vm1408_vm4, %v3778_v41, 0.0 }
 0x1f8   : > { %v1787_v62 = vadd.f32 %v3566_v32, %v1721_v42 }
 0x1f9   : > { %v1817_v61 = vpop.permute.xlu1 %1816  ;;  %v1683_v2 = vpop.permute.xlu0 %1682 }
 0x1fa   : > { %v1722_v51 = vadd.f32 %v1683_v2, %v1642_v10 }
 0x1fb   : > { %2022 = vrot.lane.b32.xlu1 %v1471_v22, %s2733_s17  ;;  %1888 = vrot.lane.b32.xlu0 %v1403_v63, %s2732_s19 }
 0x1fc   : > { %v1788_v37 = vadd.f32 %v3534_v43, %v1722_v51  ;;  %v3783_v43 = vld [vmem:[#allocation11_spill] sm:$0xff] }
 0x1fd   : > { %v1875_v3 = vpop.permute.xlu1 %1874  ;;  %v1811_v31 = vpop.permute.xlu0 %1810  ;;  %v1785_v38 = vadd.f32 %v3783_v43, %v1719_v8 }
 0x1fe   : > { %v3623_v58 = vadd.f32 %v1815_v60, %v1788_v37  ;;  %v1784_v60 = vadd.f32 %v3787_v46, %v3454_v40 }
 0x1ff   : > { %2026 = vrot.lane.b32.xlu1 %v1473_v54, %s2733_s17  ;;  %2024 = vrot.lane.b32.xlu0 %v3779_v27, %s2733_s17  ;;  %v1851_v11 = vadd.f32 %v3452_v34, %v1785_v38 }
 0x200   : > { %v1850_v2 = vadd.f32 %v3789_v6, %v1784_v60 }
 0x201   : > { %v2011_v16 = vpop.permute.xlu1 %2010  ;;  %v1877_v49 = vpop.permute.xlu0 %1876  ;;  %v1917_v24 = vadd.f32 %v1875_v3, %v1851_v11 }
 0x203   : > { %v1983_v51 = vadd.f32 %v3574_v18, %v1917_v24 }
 0x205   : > { %v1605_v39 = vpop.permute.xlu1 %1604  ;;  %v2005_v50 = vpop.permute.xlu0 %2004 }
 0x206   : > { %v1643_v19 = vadd.f32 %v1605_v39, %v1563_v13  ;;  %v2677_v13 = vld [vmem:[%s2851_s14 + $0x30] sm:$0xff] }
 0x208   : > { %v1723_v63 = vadd.f32 %v1685_v20, %v1643_v19 }
 0x209   : > { %v1813_v44 = vpop.permute.xlu1 %1812  ;;  %v1679_v17 = vpop.permute.xlu0 %1678 }
 0x20a   : > { %v1853_v57 = vadd.f32 %v1813_v44, %v1787_v62  ;;  %v1720_v10 = vadd.f32 %v1679_v17, %v1640_v1  ;;  %v1789_v22 = vadd.f32 %v3532_v4, %v1723_v63 }
 0x20c   : > { %v1919_v47 = vadd.f32 %v1879_v29, %v1853_v57  ;;  %v1786_v34 = vadd.f32 %v3568_v14, %v1720_v10  ;;  %v3644_v40 = vadd.f32 %v1817_v61, %v1789_v22 }
 0x20d   : > { %v2007_v37 = vpop.permute.xlu1 %2006  ;;  %v1873_v20 = vpop.permute.xlu0 %1872 }
 0x20e   : > { %v1985_v32 = vadd.f32 %v3551_v45, %v1919_v47  ;;  %v1852_v3 = vadd.f32 %v1811_v31, %v1786_v34  ;;  %v2049_v48 = vadd.f32 %v2007_v37, %v1983_v51  ;;  %v1916_v8 = vadd.f32 %v1873_v20, %v1850_v2  ;;  %v2674_v45 = vld [vmem:[%s2851_s14 + $0x28] sm:$0xff] }
 0x210   : > { %v2051_v41 = vadd.f32 %v2011_v16, %v1985_v32  ;;  %v1918_v4 = vadd.f32 %v1877_v49, %v1852_v3  ;;  %v2072_v54 = vadd.f32 %v3506_v9, %v2049_v48  ;;  %v1982_v29 = vadd.f32 %v3576_v36, %v1916_v8 }
 0x211   : > { %v3649_v14 = vpop.permute.xlu1 %1536  ;;  %v3651_v18 = vpop.permute.xlu0 %1534 }
 0x212   : > { %v2074_v61 = vadd.f32 %v3506_v9, %v2051_v41  ;;  %v1984_v27 = vadd.f32 %v3553_v0, %v1918_v4  ;;  %v2088_v31 = vadd.f32 %v2674_v45, %v2072_v54  ;;  %v2048_v26 = vadd.f32 %v2005_v50, %v1982_v29  ;;  %v2676_v0 = vld [vmem:[%s2851_s14 + $0x20] sm:$0xff] }
 0x214   : > { %v2090_v59 = vadd.f32 %v2675_v56, %v2074_v61  ;;  %v2050_v16 = vadd.f32 %v3596_v25, %v1984_v27  ;;  %v2104_v36 = vmax.f32 %v2088_v31, 0.0  ;;  %v2071_v49 = vadd.f32 %v3506_v9, %v2048_v26 }
 0x215   : > { %v1759_v52 = vpop.permute.xlu1 %1758  ;;  %v1757_v28 = vpop.permute.xlu0 %1756 }
 0x216   : > { %v2106_v43 = vmax.f32 %v2090_v59, 0.0  ;;  %v2073_v38 = vadd.f32 %v3506_v9, %v2050_v16  ;;  %2120 = vst.msk [vmem:[%s3524_s16 + $0x28] sm:$0xff] %vm1043_vm1, %v2104_v36  ;;  %v2087_v21 = vadd.f32 %v2676_v0, %v2071_v49 }
 0x218   : > { %2122 = vst.msk [vmem:[%s3524_s16 + $0x38] sm:$0xff] %vm1043_vm1, %v2106_v43  ;;  %v2089_v42 = vadd.f32 %v2677_v13, %v2073_v38  ;;  %v2103_v39 = vmax.f32 %v2087_v21, 0.0 }
 0x219   : > { %v1953_v25 = vpop.permute.xlu1 %1952  ;;  %v1951_v50 = vpop.permute.xlu0 %1950 }
 0x21a   : > { %v2105_v35 = vmax.f32 %v2089_v42, 0.0  ;;  %2119 = vst.msk [vmem:[%s3524_s16 + $0x20] sm:$0xff] %vm1043_vm1, %v2103_v39  ;;  %v2678_v39 = vld [vmem:[%s2851_s14 + $0x48] sm:$0xff] }
 0x21c   : > { %2121 = vst.msk [vmem:[%s3524_s16 + $0x30] sm:$0xff] %vm1043_vm1, %v2105_v35 }
 0x21d   : > { %v1533_v53 = vpop.permute.xlu1 %1532  ;;  %v1531_v23 = vpop.permute.xlu0 %1530 }
 0x21e   : > { %v1566_v10 = vadd.f32 %v1531_v23, %v3543_v15  ;;  %v1567_v3 = vadd.f32 %v1533_v53, %v3159_v12  ;;  %v2679_v53 = vld [vmem:[%s2851_s14 + $0x58] sm:$0xff] }
 0x221   : > { %v1755_v11 = vpop.permute.xlu1 %1754  ;;  %v1753_v19 = vpop.permute.xlu0 %1752 }
 0x225   : > { %v1949_v46 = vpop.permute.xlu1 %1948  ;;  %v1947_v60 = vpop.permute.xlu0 %1946 }
 0x229   : > { %v1693_v30 = vpop.permute.xlu1 %1692  ;;  %v3670_v1 = vpop.permute.xlu0 %1614 }
 0x22d   : > { %v1887_v24 = vpop.permute.xlu1 %1886  ;;  %v3672_v63 = vpop.permute.xlu0 %1822 }
 0x231   : > { %v3674_v62 = vpop.permute.xlu1 %1616  ;;  %v2017_v44 = vpop.permute.xlu0 %2016 }
 0x235   : > { %v1689_v17 = vpop.permute.xlu1 %1688  ;;  %v1611_v57 = vpop.permute.xlu0 %1610 }
 0x236   : > { %v1646_v22 = vadd.f32 %v1611_v57, %v1566_v10  ;;  %v1725_v48 = vadd.f32 %v1689_v17, %v3598_v33  ;;  %v2681_v57 = vld [vmem:[%s2851_s14 + $0x50] sm:$0xff] }
 0x238   : > { %v1791_v29 = vadd.f32 %v1755_v11, %v1725_v48  ;;  %v1568_v48 = vadd.f32 %v3651_v18, %v3489_v5 }
 0x239   : > { %v3677_v6 = vpop.permute.xlu1 %1824  ;;  %v1691_v2 = vpop.permute.xlu0 %1690 }
 0x23a   : > { %v1726_v47 = vadd.f32 %v1691_v2, %v1646_v22 }
 0x23c   : > { %v3679_v34 = vadd.f32 %v1757_v28, %v1726_v47 }
 0x23d   : > { %v1883_v51 = vpop.permute.xlu1 %1882  ;;  %v1819_v37 = vpop.permute.xlu0 %1818 }
 0x23e   : > { %v1921_v15 = vadd.f32 %v1883_v51, %v3644_v40  ;;  %v1858_v18 = vadd.f32 %v3672_v63, %v3679_v34 }
 0x240   : > { %v1987_v16 = vadd.f32 %v1949_v46, %v1921_v15 }
 0x241   : > { %v2019_v20 = vpop.permute.xlu1 %2018  ;;  %v1885_v32 = vpop.permute.xlu0 %1884 }
 0x245   : > { %v1613_v8 = vpop.permute.xlu1 %1612  ;;  %v2013_v41 = vpop.permute.xlu0 %2012 }
 0x246   : > { %v1647_v4 = vadd.f32 %v1613_v8, %v1567_v3 }
 0x248   : > { %v1727_v54 = vadd.f32 %v1693_v30, %v1647_v4 }
 0x249   : > { %v1821_v61 = vpop.permute.xlu1 %1820  ;;  %v1687_v27 = vpop.permute.xlu0 %1686 }
 0x24a   : > { %v1857_v45 = vadd.f32 %v1821_v61, %v1791_v29  ;;  %v1724_v31 = vadd.f32 %v1687_v27, %v3583_v55  ;;  %v1793_v26 = vadd.f32 %v1759_v52, %v1727_v54 }
 0x24c   : > { %v1923_v56 = vadd.f32 %v1887_v24, %v1857_v45  ;;  %v1790_v59 = vadd.f32 %v1753_v19, %v1724_v31  ;;  %v1859_v29 = vadd.f32 %v3677_v6, %v1793_v26 }
 0x24d   : > { %v2015_v12 = vpop.permute.xlu1 %2014  ;;  %v1881_v36 = vpop.permute.xlu0 %1880 }
 0x24e   : > { %v1989_v33 = vadd.f32 %v1953_v25, %v1923_v56  ;;  %v1856_v49 = vadd.f32 %v1819_v37, %v1790_v59  ;;  %v2053_v28 = vadd.f32 %v2015_v12, %v1987_v16  ;;  %v1920_v40 = vadd.f32 %v1881_v36, %v3623_v58 }
 0x250   : > { %v2055_v43 = vadd.f32 %v2019_v20, %v1989_v33  ;;  %v1922_v38 = vadd.f32 %v1885_v32, %v1856_v49  ;;  %v2076_v0 = vadd.f32 %v3506_v9, %v2053_v28  ;;  %v1986_v21 = vadd.f32 %v1947_v60, %v1920_v40 }
 0x251   : > { %v1961_v13 = vpop.permute.xlu1 %1960  ;;  %v1959_v55 = vpop.permute.xlu0 %1958  ;;  %v1569_v20 = vadd.f32 %v3649_v14, %v3143_v7 }
 0x252   : > { %v2078_v52 = vadd.f32 %v3506_v9, %v2055_v43  ;;  %v1988_v42 = vadd.f32 %v1951_v50, %v1922_v38  ;;  %v2092_v25 = vadd.f32 %v2678_v39, %v2076_v0  ;;  %v2052_v35 = vadd.f32 %v2013_v41, %v1986_v21  ;;  %v2680_v50 = vld [vmem:[%s2851_s14 + $0x40] sm:$0xff]  ;;  %v2682_v38 = vld [vmem:[%s2851_s14 + $0x68] sm:$0xff] }
 0x253   : > { %v1649_v8 = vadd.f32 %v3674_v62, %v1569_v20  ;;  %v1648_v41 = vadd.f32 %v3670_v1, %v1568_v48 }
 0x254   : > { %v2094_v23 = vadd.f32 %v2679_v53, %v2078_v52  ;;  %v2054_v58 = vadd.f32 %v2017_v44, %v1988_v42  ;;  %v2108_v11 = vmax.f32 %v2092_v25, 0.0  ;;  %v2075_v19 = vadd.f32 %v3506_v9, %v2052_v35  ;;  %v2684_v35 = vld [vmem:[%s2851_s14 + $0x78] sm:$0xff] }
 0x255   : > { %v1763_v46 = vpop.permute.xlu1 %1762  ;;  %v1761_v60 = vpop.permute.xlu0 %1760 }
 0x256   : > { %v2110_v30 = vmax.f32 %v2094_v23, 0.0  ;;  %v2077_v24 = vadd.f32 %v3506_v9, %v2054_v58  ;;  %2124 = vst.msk [vmem:[%s3524_s16 + $0x48] sm:$0xff] %vm1043_vm1, %v2108_v11  ;;  %v2091_v17 = vadd.f32 %v2680_v50, %v2075_v19  ;;  %v2685_v23 = vld [vmem:[%s2851_s14 + $0x70] sm:$0xff] }
 0x258   : > { %2126 = vst.msk [vmem:[%s3524_s16 + $0x58] sm:$0xff] %vm1043_vm1, %v2110_v30  ;;  %v2093_v10 = vadd.f32 %v2681_v57, %v2077_v24  ;;  %v2107_v22 = vmax.f32 %v2091_v17, 0.0 }
 0x259   : > { %v1957_v44 = vpop.permute.xlu1 %1956  ;;  %v1955_v2 = vpop.permute.xlu0 %1954 }
 0x25a   : > { %v2109_v47 = vmax.f32 %v2093_v10, 0.0  ;;  %2123 = vst.msk [vmem:[%s3524_s16 + $0x40] sm:$0xff] %vm1043_vm1, %v2107_v22 }
 0x25c   : > { %2125 = vst.msk [vmem:[%s3524_s16 + $0x50] sm:$0xff] %vm1043_vm1, %v2109_v47 }
 0x25d   : > { %v1895_v51 = vpop.permute.xlu1 %1894  ;;  %v1827_v37 = vpop.permute.xlu0 %1826 }
 0x261   : > { %v1697_v32 = vpop.permute.xlu1 %1696  ;;  %v1893_v3 = vpop.permute.xlu0 %1892 }
 0x262   : > { %v1729_v4 = vadd.f32 %v1697_v32, %v1649_v8 }
 0x264   : > { %v1795_v31 = vadd.f32 %v1763_v46, %v1729_v4 }
 0x265   : > { %v1891_v15 = vpop.permute.xlu1 %1890  ;;  %v1695_v54 = vpop.permute.xlu0 %1694 }
 0x266   : > { %v1728_v61 = vadd.f32 %v1695_v54, %v1648_v41  ;;  %v1925_v27 = vadd.f32 %v1891_v15, %v1859_v29 }
 0x268   : > { %v1794_v45 = vadd.f32 %v1761_v60, %v1728_v61  ;;  %v1991_v5 = vadd.f32 %v1957_v44, %v1925_v27 }
 0x269   : > { %v1829_v56 = vpop.permute.xlu1 %1828  ;;  %v2021_v7 = vpop.permute.xlu0 %2020 }
 0x26a   : > { %v1860_v14 = vadd.f32 %v1827_v37, %v1794_v45  ;;  %v1861_v59 = vadd.f32 %v1829_v56, %v1795_v31 }
 0x26c   : > { %v1927_v16 = vadd.f32 %v1895_v51, %v1861_v59  ;;  %v1926_v1 = vadd.f32 %v1893_v3, %v1860_v14 }
 0x26d   : > { %v2023_v62 = vpop.permute.xlu1 %2022  ;;  %v1889_v12 = vpop.permute.xlu0 %1888 }
 0x26e   : > { %v2057_v36 = vadd.f32 %v2023_v62, %v1991_v5  ;;  %v1924_v33 = vadd.f32 %v1889_v12, %v1858_v18  ;;  %v1993_v49 = vadd.f32 %v1961_v13, %v1927_v16  ;;  %v1992_v28 = vadd.f32 %v1959_v55, %v1926_v1  ;;  %v2683_v55 = vld [vmem:[%s2851_s14 + $0x60] sm:$0xff] }
 0x270   : > { %v2080_v6 = vadd.f32 %v3506_v9, %v2057_v36  ;;  %v1990_v26 = vadd.f32 %v1955_v2, %v1924_v33 }
 0x271   : > { %v2027_v40 = vpop.permute.xlu1 %2026  ;;  %v2025_v43 = vpop.permute.xlu0 %2024 }
 0x272   : > { %v2096_v0 = vadd.f32 %v2682_v38, %v2080_v6  ;;  %v2056_v21 = vadd.f32 %v2021_v7, %v1990_v26  ;;  %v2059_v63 = vadd.f32 %v2027_v40, %v1993_v49  ;;  %v2058_v34 = vadd.f32 %v2025_v43, %v1992_v28 }
 0x274   : > { %v2112_v52 = vmax.f32 %v2096_v0, 0.0  ;;  %v2079_v42 = vadd.f32 %v3506_v9, %v2056_v21  ;;  %v2082_v39 = vadd.f32 %v3506_v9, %v2059_v63  ;;  %v2081_v13 = vadd.f32 %v3506_v9, %v2058_v34 }
 0x276   : > { %2128 = vst.msk [vmem:[%s3524_s16 + $0x68] sm:$0xff] %vm1043_vm1, %v2112_v52  ;;  %v2095_v25 = vadd.f32 %v2683_v55, %v2079_v42  ;;  %v2098_v53 = vadd.f32 %v2684_v35, %v2082_v39  ;;  %v2097_v58 = vadd.f32 %v2685_v23, %v2081_v13 }
 0x278   : > { %v2111_v11 = vmax.f32 %v2095_v25, 0.0  ;;  %v2114_v19 = vmax.f32 %v2098_v53, 0.0  ;;  %v2113_v46 = vmax.f32 %v2097_v58, 0.0 }
 0x27a   : > { %2127 = vst.msk [vmem:[%s3524_s16 + $0x60] sm:$0xff] %vm1043_vm1, %v2111_v11  ;;  %2130 = vst.msk [vmem:[%s3524_s16 + $0x78] sm:$0xff] %vm1043_vm1, %v2114_v19 }
 0x27b   : > { %2129 = vst.msk [vmem:[%s3524_s16 + $0x70] sm:$0xff] %vm1043_vm1, %v2113_v46 }
 0x27c PF: > { %s22_s25 = sadd.s32 1, %s2724_s25   ;;  %s3790_s13 = sld [smem:[#allocation2_spill]] }
 0x27d   : > { %p19_p12 = scmp.ge.s32.totalorder %s22_s25, 6   ;;  %s3791_s15 = sld [smem:[#allocation3_spill]] }
 0x27e   : > { %s3792_s21 = smov %s2716_s23  ;;  %s3793_s22 = smov %s2720_s24 }
 0x27f   :  { %21 = sbr.rel (!%p19_p12) target bundleno = 4 (0x4), region = 122 }
 0x282   : > { %s3794_s23 = smov %s3790_s13 }
 0x283   : > { %s3795_s24 = smov %s3791_s15 }

</bundles_post_ra>
